<compile_context>
chip_gen: v6e
topology: v6e:2x2x1
jax: 0.10.0
libtpu: 0.0.40
codegen_flags: <defaults>
</compile_context>

<pallas_src>
import numpy as np

import jax
import jax.numpy as jnp
from jax.experimental import pallas as pl
from jax.experimental.pallas import tpu as pltpu


# Below this many input elements the fused XLA reduce wins over a standalone
# Pallas launch; force_pallas=True overrides (used by the demo).
_PALLAS_MIN_ELEMENTS = 1 << 20
# Target bytes of *input* per grid step (double-buffered by Pallas).
_TARGET_BLOCK_BYTES = 8 * 1024 * 1024
_VMEM_LIMIT_BYTES = 32 * 1024 * 1024  # safe on v5e (128 MiB), v6e (128), v7x (64)


def _selection_matrix(n_agents, k, dtype):
    """Static 0/1 matrix S of shape (128*N, 128).

    Input row element j = g*(N*K) + n*K + k  (group g, agent n, feature k)
    maps to output column c = g*K + k, i.e. out[:, c] = sum_n in[:, ...].
    Exact in f32/bf16 (entries are 0.0 / 1.0).
    """
    w = 128 * n_agents
    g_size = n_agents * k
    j = np.arange(w)
    col = (j // g_size) * k + (j % k)
    sel = (col[:, None] == np.arange(128)[None, :]).astype(np.dtype(dtype))
    return jnp.asarray(sel)


def _vdn_group_sum_kernel(x_ref, s_ref, o_ref):
    # x_ref: (row_tile, 128*N) lane-dense input block
    # s_ref: (128*N, 128) static selection matrix (constant block, DMA'd once)
    # o_ref: (row_tile, 128) lane-dense output block
    o_ref[...] = jnp.dot(
        x_ref[...],
        s_ref[...],
        preferred_element_type=jnp.float32,
        precision=jax.lax.Precision.HIGHEST,  # exact f32 group sums on the MXU
    ).astype(o_ref.dtype)


def _vdn_reduce_pallas(x4, core_parallel=False):
    """Sum (B, T, N, K) over axis 2 -> (B, T, 1, K).

    Requires (B*T*K) % 128 == 0 and 128 % K == 0 (checked by the caller) so
    the reshape below is zero-copy and agent groups never straddle a row.
    """
    B, T, N, K = x4.shape
    dtype = x4.dtype
    itemsize = jnp.dtype(dtype).itemsize

    W = 128 * N                # elements per row = (128 // K) groups of N*K
    R = (B * T * K) // 128     # number of rows (exact by precondition)

    x2 = x4.reshape(R, W)      # zero-copy: same contiguous buffer
    sel = _selection_matrix(N, K, dtype)

    # Row tile: ~8 MiB of input per step, multiple of 8 sublanes (or full R).
    rows_for_target = max(8, _TARGET_BLOCK_BYTES // (W * itemsize))
    rows_for_target = (rows_for_target // 8) * 8
    row_tile = R if R <= rows_for_target else rows_for_target
    grid = (pl.cdiv(R, row_tile),)

    cost = pl.CostEstimate(
        flops=2 * R * W * 128,                                    # MXU selection matmul
        transcendentals=0,
        bytes_accessed=(R * W + R * 128 + W * 128) * itemsize,    # in + out + S
    )

    dim_sem = (pltpu.CORE_PARALLEL,) if core_parallel else ("parallel",)

    out2 = pl.pallas_call(
        _vdn_group_sum_kernel,
        out_shape=jax.ShapeDtypeStruct((R, 128), dtype),
        grid_spec=pl.GridSpec(
            grid=grid,
            in_specs=[
                # (row_tile, 128*N): sublanes from row_tile (mult of 8 or full),
                # lanes = 128*N (multiple of 128) -> dense vregs, dense DMA.
                pl.BlockSpec((row_tile, W), lambda i: (i, 0)),
                # Constant block: same index every step -> fetched once.
                pl.BlockSpec((W, 128), lambda i: (0, 0)),
            ],
            out_specs=pl.BlockSpec((row_tile, 128), lambda i: (i, 0)),
        ),
        compiler_params=pltpu.CompilerParams(
            dimension_semantics=dim_sem,
            vmem_limit_bytes=_VMEM_LIMIT_BYTES,
        ),
        cost_estimate=cost,
    )(x2, sel)

    # (R, 128) flat order == (b*T + t)*K + k  ->  (B, T, K) -> (B, T, 1, K)
    return out2.reshape(B, T, K)[:, :, None, :]


def vdn_mixer_forward(agent_qs, batch=None, *, force_pallas=False,
                      core_parallel=False):
    """Pallas implementation of VDNMixer.forward.

    agent_qs: (B, T, N) or (B, T, N, K) array (K is normally 1).
    batch:    unused (matches the PyTorch signature).
    Returns the same result as th.sum(agent_qs, dim=2, keepdim=True) followed
    by squeeze(3) when that 4-D axis has size 1.
    """
    del batch  # unused, as in the reference module
    x = agent_qs
    assert x.ndim in (3, 4), "agent_qs must be 3-D or 4-D"

    was_3d = x.ndim == 3
    x4 = x[..., None] if was_3d else x          # zero-copy expand
    B, T, N, K = x4.shape

    pallas_ok = (
        N > 1
        and jnp.issubdtype(x4.dtype, jnp.floating)   # integer sums: keep torch semantics via jnp
        and K <= 128 and (128 % K == 0)              # groups align with 128-lane rows
        and ((B * T * K) % 128 == 0)                 # zero-copy (R, 128*N) reshape
    )
    big_enough = force_pallas or (B * T * N * K >= _PALLAS_MIN_ELEMENTS)

    if pallas_ok and big_enough:
        out4 = _vdn_reduce_pallas(x4, core_parallel=core_parallel)
    else:
        # Fused XLA reduce is already at HBM roofline for this op.
        out4 = jnp.sum(x4, axis=2, keepdims=True)

    if was_3d:
        return out4[..., 0]                     # (B, T, 1)
    if K == 1:
        return jnp.squeeze(out4, axis=3)        # (B, T, 1), like torch squeeze(3)
    return out4                                 # (B, T, 1, K)


if __name__ == "__main__":
    key = jax.random.PRNGKey(0)
    # Small shapes, with B*T a multiple of 128 so the zero-copy Pallas path runs.
    B, T, N = 4, 64, 4
    agent_qs = jax.random.normal(key, (B, T, N, 1), dtype=jnp.float32)
    ref = jnp.sum(agent_qs, axis=2)  # (B, T, 1): torch sum(keepdim) + squeeze(3)

    # 4-D input through the Pallas kernel.
    out = jax.block_until_ready(vdn_mixer_forward(agent_qs, force_pallas=True))
    assert out.shape == (B, T, 1), out.shape
    assert jnp.allclose(out, ref, atol=1e-5, rtol=1e-5)

    # 3-D input through the Pallas kernel.
    out3 = jax.block_until_ready(
        vdn_mixer_forward(agent_qs[..., 0], force_pallas=True))
    assert out3.shape == (B, T, 1), out3.shape
    assert jnp.allclose(out3, ref, atol=1e-5, rtol=1e-5)

    # Shape that cannot be expressed zero-copy -> jnp.sum fallback path.
    small = jax.random.normal(jax.random.PRNGKey(1), (2, 8, 4, 1), jnp.float32)
    outs = jax.block_until_ready(vdn_mixer_forward(small, force_pallas=True))
    assert outs.shape == (2, 8, 1), outs.shape
    assert jnp.allclose(outs, jnp.sum(small, axis=2), atol=1e-6, rtol=1e-6)

    print("KERNEL_OK")
</pallas_src>

<mosaic_0001>
module attributes {stable_mosaic.version = 11 : i64} {
  func.func @_vdn_group_sum_kernel(%arg0: i32, %arg1: memref<2x512xf32, #tpu.memory_space<vmem>>, %arg2: memref<512x128xf32, #tpu.memory_space<vmem>>, %arg3: memref<2x128xf32, #tpu.memory_space<vmem>>) attributes {dimension_semantics = [#tpu.dimension_semantics<parallel>], iteration_bounds = array<i64: 1>, scalar_prefetch = 0 : i64, scratch_operands = 0 : i64, tpu.core_type = #tpu.core_type<tc>, window_params = [{transform_indices = @transform_0, window_bounds = array<i64: 2, 512>}, {pipeline_mode = #tpu.pipeline_mode<synchronous>, transform_indices = @transform_1, window_bounds = array<i64: 512, 128>}, {transform_indices = @transform_2, window_bounds = array<i64: 2, 128>}]} {
    %c0 = arith.constant 0 : index
    %c0_0 = arith.constant 0 : index
    %0 = vector.load %arg1[%c0, %c0_0] : memref<2x512xf32, #tpu.memory_space<vmem>>, vector<2x512xf32>
    %c0_1 = arith.constant 0 : index
    %c0_2 = arith.constant 0 : index
    %1 = vector.load %arg2[%c0_1, %c0_2] : memref<512x128xf32, #tpu.memory_space<vmem>>, vector<512x128xf32>
    %cst = arith.constant dense<0.000000e+00> : vector<2x128xf32>
    %2 = tpu.matmul %0, %1, %cst {dimension_numbers = #tpu.dot_dimension_numbers<[1], [0], [0], [1], [0, 0, 1, 1], [], []>, precision = #tpu.contract_precision<fp32>} : vector<2x512xf32>, vector<512x128xf32>, vector<2x128xf32> -> vector<2x128xf32>
    %c0_3 = arith.constant 0 : index
    %c0_4 = arith.constant 0 : index
    %3 = vector.load %arg3[%c0_3, %c0_4] : memref<2x128xf32, #tpu.memory_space<vmem>>, vector<2x128xf32>
    tpu.vector_store %arg3[%c0_3, %c0_4], %2 {strides = array<i32>} : memref<2x128xf32, #tpu.memory_space<vmem>>, vector<2x128xf32>,
    return
  }
  func.func @transform_0(%arg0: i32) -> (i32, i32) {
    %c0_i32 = arith.constant 0 : i32
    %c0_i32_0 = arith.constant 0 : i32
    return %arg0, %c0_i32 : i32, i32
  }
  func.func @transform_1(%arg0: i32) -> (i32, i32) {
    %c0_i32 = arith.constant 0 : i32
    %c0_i32_0 = arith.constant 0 : i32
    %c0_i32_1 = arith.constant 0 : i32
    return %c0_i32, %c0_i32_0 : i32, i32
  }
  func.func @transform_2(%arg0: i32) -> (i32, i32) {
    %c0_i32 = arith.constant 0 : i32
    %c0_i32_0 = arith.constant 0 : i32
    return %arg0, %c0_i32 : i32, i32
  }
}

</mosaic_0001>

<bundles_post_ra>
// kernel: tpu_custom_call.1
= control target key start
LH: loop header
LB: loop body
LE: loop exit
PB: predicated region body
PF: predicated region fallthrough
CT: control target
= control target key end

     0   :  { %7 = vsyncpa [#allocation3], 0  ;;  %s3584_s0 = inlined_call_operand.hbm [shape: f32[2,512], index: 0, kind: input, shape index: {}]   ;;  %s3585_s1 = inlined_call_operand.hbm [shape: f32[512,128], index: 1, kind: input, shape index: {}]   ;;  %s3586_s2 = inlined_call_operand.hbm [shape: f32[2,128], index: 2, kind: output, shape index: {}]  }
   0x1   :  { %8 = vsyncpa [#allocation6], 0 }
   0x2   :  { %9 = vsyncpa [#allocation4], 0  ;;  %s2359_s9 = smov [#allocation2]   ;;  %s2360_s11 = smov [#allocation5]  }
   0x3   :  { %s16_s10 = sshll.u32 %s2359_s9, 4  ;;  %s25_s12 = sshll.u32 %s2360_s11, 4  ;;  %s17_s10 = int_to_ptr.vmem [resolvable:$true] %s16_s10  ;;  %s26_s12 = int_to_ptr.vmem [resolvable:$true] %s25_s12 }
   0x4   :  { %s2301_s13 = scalar_lea.vmem %s17_s10, 128  ;;  %p2306_p1 = scmp.lt.s32.totalorder %s17_s10, %s17_s10 }
   0x5   :  { %p2302_p0 = scmp.ne.s32.totalorder %s17_s10, %s2301_s13  ;;  %p2307_p2 = scmp.lt.s32.totalorder %s2301_s13, %s2301_s13 }
   0x7   :  { %p2308_p3 = por %p2307_p2, %p2306_p1 }
   0x9   :  { %p2309_p4 = pnand %p2308_p3, %p2302_p0 }
   0xb   :  { %2312 = shalt.err (!%p2309_p4)
}
   0xc   :  { %19 = dma.hbm_to_vmem [thread:$0]  %s3584_s0, 128, %s17_s10, [#allocation3]  }
   0xd   :  { %s2321_s16 = scalar_lea.vmem %s26_s12, 8192  ;;  %p2326_p6 = scmp.lt.s32.totalorder %s26_s12, %s26_s12 }
   0xe   :  { %p2322_p5 = scmp.ne.s32.totalorder %s26_s12, %s2321_s16  ;;  %p2327_p7 = scmp.lt.s32.totalorder %s2321_s16, %s2321_s16 }
  0x10   :  { %p2328_p8 = por %p2327_p7, %p2326_p6 }
  0x12   :  { %p2329_p9 = pnand %p2328_p8, %p2322_p5 }
  0x14   :  { %2332 = shalt.err (!%p2329_p9)
}
  0x15   :  { %s2361_s17 = smov 128   ;;  %s2362_s18 = smov 8  }
  0x16   :  { %31 = dma.hbm_to_vmem [thread:$0]  %s3585_s1, 8192, %s26_s12, [#allocation6], %s2361_s17, %s2361_s17, %s2362_s18  }
  0x17   :  { %2353 = dma.done.wait [#allocation3], 128  }
  0x18   :  { %2354 = vsyncadd [#allocation3], 4294967168 }
  0x19   :  { %2355 = dma.done.wait [#allocation6], 8192  }
  0x1a   :  { %2356 = vsyncadd [#allocation6], 4294959104  ;;  %v2363_v0 = vmov 1983009808   ;;  %v108_v2 = vlaneseq  ;;  %v70_v5 = vld [vmem:[#allocation5 + $0xf8] sm:$0xff]  ;;  %v69_v7 = vld [vmem:[#allocation5 + $0xf0] sm:$0xff] }
  0x1b   :  { %v106_v1 = vunpack.c.l.s4 %v2363_v0  ;;  %v54_v6 = vld [vmem:[#allocation5 + $0x78] sm:$0xff]  ;;  %v2386_v8 = vand.u32 4294901760, %v70_v5  ;;  %v2390_v10 = vand.u32 4294901760, %v69_v7  ;;  %v53_v11 = vld [vmem:[#allocation5 + $0x70] sm:$0xff]  ;;  %v68_v12 = vld [vmem:[#allocation5 + $0xe8] sm:$0xff]  ;;  %s2364_s0 = smov [#allocation7]  }
  0x1c   :  { %v109_v4 = vshrl.u32 %v108_v2, 7  ;;  %v2388_v9 = vand.u32 4294901760, %v54_v6  ;;  %v52_v13 = vld [vmem:[#allocation5 + $0x68] sm:$0xff]  ;;  %v2392_v14 = vand.u32 4294901760, %v53_v11  ;;  %v2394_v15 = vand.u32 4294901760, %v68_v12  ;;  %v67_v17 = vld [vmem:[#allocation5 + $0xe0] sm:$0xff] }
  0x1d   :  { %v107_v3 = vunpack.c.0.s8 %v106_v1  ;;  %v2396_v16 = vand.u32 4294901760, %v52_v13  ;;  %v51_v18 = vld [vmem:[#allocation5 + $0x60] sm:$0xff]  ;;  %v2398_v19 = vld [vmem:[#allocation5 + $0xd8] sm:$0xff]  ;;  %1866 = vmatprep.subr.mxu0 %v2386_v8  ;;  %v2403_v21 = vand.u32 4294901760, %v67_v17  ;;  %v2411_v24 = vsub.f32 %v70_v5, %v2386_v8  ;;  %v2415_v26 = vld [vmem:[#allocation5 + $0xd0] sm:$0xff]  ;;  %s1856_s1 = sshll.u32 %s2364_s0, 4  ;;  %s1857_s1 = int_to_ptr.vmem [resolvable:$true] %s1856_s1 }
  0x1e   :  { %v2405_v22 = vand.u32 4294901760, %v51_v18  ;;  %v2408_v23 = vand.u32 4294901760, %v2398_v19  ;;  %v2413_v25 = vld [vmem:[#allocation5 + $0x58] sm:$0xff]  ;;  %v2417_v27 = vld [vmem:[#allocation5 + $0x50] sm:$0xff]  ;;  %1867 = vmatpush3.msra.mxu0 %v2388_v9  ;;  %v2424_v29 = vsub.f32 %v54_v6, %v2388_v9  ;;  %v2427_v30 = vand.u32 4294901760, %v2415_v26  ;;  %v2432_v32 = vld [vmem:[#allocation5 + $0xc8] sm:$0xff]  ;;  %p2338_p11 = scmp.lt.s32.totalorder %s1857_s1, %s1857_s1 }
  0x1f   :  { %v2400_v20 = vsub.s32 %v107_v3, %v109_v4  ;;  %3726 = vst [vmem:[#allocation11_spill] sm:$0xff] %v2411_v24  ;;  %v2421_v28 = vand.u32 4294901760, %v2413_v25  ;;  %v2430_v31 = vsub.f32 %v69_v7, %v2390_v10  ;;  %v2434_v33 = vld [vmem:[#allocation5 + $0x48] sm:$0xff]  ;;  %v2436_v34 = vld [vmem:[#allocation5 + $0xc0] sm:$0xff]  ;;  %1868 = vmatprep.subr.mxu0 %v2390_v10  ;;  %v3599_v35 = vand.u32 4294901760, %v2411_v24  ;;  %v2482_v52 = vld [vmem:[#allocation5 + $0xb8] sm:$0xff] }
  0x20   :  { %v2441_v36 = vand.u32 4294901760, %v2417_v27  ;;  %v2444_v37 = vsub.f32 %v53_v11, %v2392_v14  ;;  %v2447_v38 = vand.u32 4294901760, %v2432_v32  ;;  %1869 = vmatpush3.msra.mxu0 %v2392_v14  ;;  %v3598_v39 = vand.u32 4294901760, %v2424_v29  ;;  %v2458_v43 = vld [vmem:[#allocation5 + $0x40] sm:$0xff]  ;;  %v2492_v57 = vld [vmem:[#allocation5 + $0x38] sm:$0xff]  ;;  %v2499_v62 = vld [vmem:[#allocation5 + $0xb0] sm:$0xff] }
  0x21   :  { %v3596_v40 = vand.u32 4294901760, %v2430_v31  ;;  %v2453_v41 = vsub.f32 %v68_v12, %v2394_v15  ;;  %v2456_v42 = vand.u32 4294901760, %v2434_v33  ;;  %1870 = vmatprep.subr.mxu0 %v2394_v15  ;;  %v353_v44 = vsub.f32 %v2411_v24, %v3599_v35  ;;  %v2511_v3 = vld [vmem:[#allocation5 + $0x30] sm:$0xff]  ;;  %v2524_v11 = vld [vmem:[#allocation5 + $0xa8] sm:$0xff]  ;;  %s2333_s21 = scalar_lea.vmem %s1857_s1, 32 }
  0x22   :  { %3727 = vst [vmem:[#allocation12_spill] sm:$0xff] %v2447_v38  ;;  %v3594_v45 = vand.u32 4294901760, %v2444_v37  ;;  %v2466_v46 = vsub.f32 %v52_v13, %v2396_v16  ;;  %v2469_v47 = vand.u32 4294901760, %v2436_v34  ;;  %1871 = vmatpush3.msra.mxu0 %v2396_v16  ;;  %v241_v48 = vsub.f32 %v2424_v29, %v3598_v39  ;;  %v2625_v39 = vld [vmem:[#allocation5 + $0x10] sm:$0xff]  ;;  %p2334_p10 = scmp.ne.s32.totalorder %s1857_s1, %s2333_s21  ;;  %p2339_p12 = scmp.lt.s32.totalorder %s2333_s21, %s2333_s21 }
  0x23   :  { %3728 = vst [vmem:[#allocation13_spill] sm:$0xff] %v2456_v42  ;;  %v360_v49 = vsub.f32 %v2430_v31, %v3596_v40  ;;  %v3593_v50 = vand.u32 4294901760, %v2453_v41  ;;  %v2480_v51 = vsub.f32 %v67_v17, %v2403_v21  ;;  %1872 = vmatprep.subr.mxu0 %v2403_v21  ;;  %v354_v53 = vand.u32 4294901760, %v353_v44  ;;  %v2615_v40 = vld [vmem:[#allocation5 + $0x90] sm:$0xff] }
  0x24   :  { %3729 = vst [vmem:[#allocation14_spill] sm:$0xff] %v2469_v47  ;;  %v248_v54 = vsub.f32 %v2444_v37, %v3594_v45  ;;  %v3591_v55 = vand.u32 4294901760, %v2466_v46  ;;  %v2490_v56 = vand.u32 4294901760, %v2458_v43  ;;  %1873 = vmatpush3.msra.mxu0 %v2405_v22  ;;  %v242_v58 = vand.u32 4294901760, %v241_v48  ;;  %p2340_p13 = por %p2339_p12, %p2338_p11 }
  0x25   :  { %v361_v59 = vand.u32 4294901760, %v360_v49  ;;  %v367_v60 = vsub.f32 %v2453_v41, %v3593_v50  ;;  %v3589_v61 = vand.u32 4294901760, %v2480_v51  ;;  %1874 = vmatprep.subr.mxu0 %v2408_v23  ;;  %1901 = vmatprep.subr.mxu1 %v354_v53  ;;  %v2506_v1 = vsub.f32 %v51_v18, %v2405_v22  ;;  %v2602_v50 = vld [vmem:[#allocation5 + $0x18] sm:$0xff] }
  0x26   :  { %3730 = vst [vmem:[#allocation15_spill] sm:$0xff] %v2490_v56  ;;  %v249_v63 = vand.u32 4294901760, %v248_v54  ;;  %v255_v0 = vsub.f32 %v2466_v46, %v3591_v55  ;;  %v2509_v2 = vand.u32 4294901760, %v2482_v52  ;;  %1875 = vmatpush3.msra.mxu0 %v2421_v28  ;;  %1902 = vmatpush3.msra.mxu1 %v242_v58  ;;  %v2519_v6 = vsub.f32 %v2398_v19, %v2408_v23  ;;  %v2535_v19 = vld [vmem:[#allocation5 + $0x28] sm:$0xff]  ;;  %p2341_p0 = pnand %p2340_p13, %p2334_p10 }
  0x27   :  { %v368_v4 = vand.u32 4294901760, %v367_v60  ;;  %v374_v5 = vsub.f32 %v2480_v51, %v3589_v61  ;;  %v2522_v7 = vand.u32 4294901760, %v2492_v57  ;;  %1876 = vmatprep.subr.mxu0 %v2427_v30  ;;  %1903 = vmatprep.subr.mxu1 %v361_v59  ;;  %v3588_v13 = vand.u32 4294901760, %v2506_v1 }
  0x28   :  { %3731 = vst [vmem:[#allocation16_spill] sm:$0xff] %v2509_v2  ;;  %v256_v12 = vand.u32 4294901760, %v255_v0  ;;  %v2530_v17 = vsub.f32 %v2413_v25, %v2421_v28  ;;  %v2533_v18 = vand.u32 4294901760, %v2499_v62  ;;  %1877 = vmatpush3.msra.mxu0 %v2441_v36  ;;  %1904 = vmatpush3.msra.mxu1 %v249_v63  ;;  %v3587_v48 = vand.u32 4294901760, %v2519_v6 }
  0x29   :  { %3732 = vst [vmem:[#allocation17_spill] sm:$0xff] %v2522_v7  ;;  %v375_v44 = vand.u32 4294901760, %v374_v5  ;;  %v2541_v49 = vsub.f32 %v2415_v26, %v2427_v30  ;;  %v2544_v53 = vand.u32 4294901760, %v2511_v3  ;;  %1878 = vmatprep.subr.mxu0 %v2447_v38  ;;  %1905 = vmatprep.subr.mxu1 %v368_v4  ;;  %v262_v25 = vsub.f32 %v2506_v1, %v3588_v13  ;;  %v2558_v26 = vld [vmem:[#allocation5 + $0xa0] sm:$0xff] }
  0x2a   :  { %3733 = vst [vmem:[#allocation18_spill] sm:$0xff] %v2533_v18  ;;  %v3590_v54 = vand.u32 4294901760, %v2530_v17  ;;  %v2553_v58 = vsub.f32 %v2417_v27, %v2441_v36  ;;  %v2556_v59 = vand.u32 4294901760, %v2524_v11  ;;  %1879 = vmatpush3.msra.mxu0 %v2456_v42  ;;  %1906 = vmatpush3.msra.mxu1 %v256_v12  ;;  %v381_v60 = vsub.f32 %v2519_v6, %v3587_v48  ;;  %v2581_v13 = vld [vmem:[#allocation5 + $0x20] sm:$0xff] }
  0x2b   :  { %3734 = vst [vmem:[#allocation19_spill] sm:$0xff] %v2544_v53  ;;  %v3592_v63 = vand.u32 4294901760, %v2541_v49  ;;  %v2567_v0 = vsub.f32 %v2432_v32, %v2447_v38  ;;  %v2570_v27 = vand.u32 4294901760, %v2535_v19  ;;  %1880 = vmatprep.subr.mxu0 %v2469_v47  ;;  %1907 = vmatprep.subr.mxu1 %v375_v44  ;;  %v263_v4 = vand.u32 4294901760, %v262_v25  ;;  %v2714_v38 = vld [vmem:[#allocation2] sm:$0xff] }
  0x2c   :  { %3735 = vst [vmem:[#allocation20_spill] sm:$0xff] %v2556_v59  ;;  %v269_v5 = vsub.f32 %v2530_v17, %v3590_v54  ;;  %v3595_v12 = vand.u32 4294901760, %v2553_v58  ;;  %v2579_v48 = vsub.f32 %v2434_v33, %v2456_v42  ;;  %1881 = vmatpush3.msra.mxu0 %v2490_v56  ;;  %v382_v32 = vand.u32 4294901760, %v381_v60  ;;  %v2591_v54 = vld [vmem:[#allocation5 + $0x98] sm:$0xff] }
  0x2d   :  { %3736 = vst [vmem:[#allocation21_spill] sm:$0xff] %v2570_v27  ;;  %v388_v44 = vsub.f32 %v2541_v49, %v3592_v63  ;;  %v3597_v25 = vand.u32 4294901760, %v2567_v0  ;;  %v2589_v61 = vand.u32 4294901760, %v2558_v26  ;;  %1908 = vmatpush3.msra.mxu1 %v263_v4  ;;  %1882 = vmatprep.subr.mxu0 %v2509_v2  ;;  %v2600_v63 = vsub.f32 %v2436_v34, %v2469_v47 }
  0x2e   :  { %v270_v33 = vand.u32 4294901760, %v269_v5  ;;  %v276_v55 = vsub.f32 %v2553_v58, %v3595_v12  ;;  %v3600_v60 = vand.u32 4294901760, %v2579_v48  ;;  %1909 = vmatprep.subr.mxu1 %v382_v32  ;;  %1883 = vmatpush3.msra.mxu0 %v2522_v7  ;;  %v2609_v5 = vand.u32 4294901760, %v2581_v13 }
  0x2f   :  { %3737 = vst [vmem:[#allocation22_spill] sm:$0xff] %v2589_v61  ;;  %v389_v45 = vand.u32 4294901760, %v388_v44  ;;  %v395_v4 = vsub.f32 %v2567_v0, %v3597_v25  ;;  %v2613_v12 = vsub.f32 %v2458_v43, %v2490_v56  ;;  %1884 = vmatprep.subr.mxu0 %v2533_v18  ;;  %v2623_v25 = vand.u32 4294901760, %v2591_v54 }
  0x30   :  { %1910 = vmatpush3.msra.mxu1 %v270_v33  ;;  %v277_v34 = vand.u32 4294901760, %v276_v55  ;;  %v283_v32 = vsub.f32 %v2579_v48, %v3600_v60  ;;  %1885 = vmatpush3.msra.mxu0 %v2544_v53  ;;  %v2631_v55 = vsub.f32 %v2482_v52, %v2509_v2  ;;  %v2634_v35 = vand.u32 4294901760, %v2602_v50  ;;  %v2636_v60 = vld [vmem:[#allocation5 + $0x88] sm:$0xff] }
  0x31   :  { %3738 = vst [vmem:[#allocation23_spill] sm:$0xff] %v2623_v25  ;;  %1911 = vmatprep.subr.mxu1 %v389_v45  ;;  %v396_v43 = vand.u32 4294901760, %v395_v4  ;;  %v3607_v33 = vand.u32 4294901760, %v2613_v12  ;;  %1886 = vmatprep.subr.mxu0 %v2556_v59  ;;  %v3740_v45 = vand.u32 4294901760, %v2600_v63  ;;  %v2644_v4 = vsub.f32 %v2492_v57, %v2522_v7  ;;  %v2661_v57 = vld [vmem:[#allocation5 + $0x8] sm:$0xff] }
  0x32   :  { %3739 = vst [vmem:[#allocation24_spill] sm:$0xff] %v2634_v35  ;;  %1912 = vmatpush3.msra.mxu1 %v277_v34  ;;  %v284_v44 = vand.u32 4294901760, %v283_v32  ;;  %v2647_v52 = vand.u32 4294901760, %v2615_v40  ;;  %1887 = vmatpush3.msra.mxu0 %v2570_v27  ;;  %v2656_v2 = vsub.f32 %v2499_v62, %v2533_v18  ;;  %v2670_v32 = vand.u32 4294901760, %v2636_v60  ;;  %v2672_v62 = vld [vmem:[#allocation5 + $0x80] sm:$0xff] }
  0x33   :  { %v402_v56 = vsub.f32 %v2600_v63, %v3740_v45  ;;  %3741 = vst [vmem:[#allocation25_spill] sm:$0xff] %v2644_v4  ;;  %1913 = vmatprep.subr.mxu1 %v396_v43  ;;  %v290_v34 = vsub.f32 %v2613_v12, %v3607_v33  ;;  %v2659_v45 = vand.u32 4294901760, %v2625_v39  ;;  %1888 = vmatprep.subr.mxu0 %v2589_v61  ;;  %v3745_v47 = vand.u32 4294901760, %v2631_v55 }
  0x34   :  { %3742 = vst [vmem:[#allocation26_spill] sm:$0xff] %v2647_v52  ;;  %3743 = vst [vmem:[#allocation27_spill] sm:$0xff] %v2656_v2  ;;  %1914 = vmatpush3.msra.mxu1 %v284_v44  ;;  %v2667_v33 = vsub.f32 %v2511_v3, %v2544_v53  ;;  %1889 = vmatpush3.msra.mxu0 %v2609_v5  ;;  %v2681_v7 = vsub.f32 %v2524_v11, %v2556_v59  ;;  %v3746_v3 = vand.u32 4294901760, %v2644_v4 }
  0x35   :  { %3744 = vst [vmem:[#allocation28_spill] sm:$0xff] %v2659_v45  ;;  %v403_v43 = vand.u32 4294901760, %v402_v56  ;;  %v291_v18 = vand.u32 4294901760, %v290_v34  ;;  %v409_v44 = vsub.f32 %v2631_v55, %v3745_v47  ;;  %1890 = vmatprep.subr.mxu0 %v2623_v25  ;;  %v2689_v34 = vand.u32 4294901760, %v2661_v57  ;;  %v2695_v56 = vld [vmem:[#allocation5] sm:$0xff] }
  0x36   :  { %v297_v53 = vsub.f32 %v2644_v4, %v3746_v3  ;;  %v2693_v47 = vsub.f32 %v2535_v19, %v2570_v27  ;;  %1891 = vmatpush3.msra.mxu0 %v2634_v35  ;;  %v3628_v3 = vand.u32 4294901760, %v2681_v7  ;;  %v2703_v42 = vand.u32 4294901760, %v2672_v62 }
  0x37   :  { %1915 = vmatprep.subr.mxu1 %v403_v43  ;;  %3747 = vst [vmem:[#allocation29_spill] sm:$0xff] %v2689_v34  ;;  %v410_v11 = vand.u32 4294901760, %v409_v44  ;;  %v3748_v43 = vand.u32 4294901760, %v2656_v2  ;;  %1892 = vmatprep.subr.mxu0 %v2647_v52  ;;  %v3750_v19 = vand.u32 4294901760, %v2667_v33  ;;  %v2712_v44 = vsub.f32 %v2558_v26, %v2589_v61 }
  0x38   :  { %1916 = vmatpush3.msra.mxu1 %v291_v18  ;;  %3749 = vst [vmem:[#allocation30_spill] sm:$0xff] %v2703_v42  ;;  %v298_v4 = vand.u32 4294901760, %v297_v53  ;;  %v3629_v18 = vand.u32 4294901760, %v2693_v47  ;;  %1893 = vmatpush3.msra.mxu0 %v2659_v45  ;;  %v423_v53 = vsub.f32 %v2681_v7, %v3628_v3 }
  0x39   :  { %v416_v59 = vsub.f32 %v2656_v2, %v3748_v43  ;;  %v304_v27 = vsub.f32 %v2667_v33, %v3750_v19  ;;  %1917 = vmatprep.subr.mxu1 %v410_v11  ;;  %v2721_v2 = vand.u32 4294901760, %v2695_v56  ;;  %v2725_v19 = vsub.f32 %v2581_v13, %v2609_v5  ;;  %1894 = vmatprep.subr.mxu0 %v2670_v32 }
  0x3a   :  { %1918 = vmatpush3.msra.mxu1 %v298_v4  ;;  %v3630_v11 = vand.u32 4294901760, %v2712_v44  ;;  %v424_v61 = vand.u32 4294901760, %v423_v53  ;;  %1895 = vmatpush3.msra.mxu0 %v2689_v34  ;;  %v111_v13 = vrot.slane %v2714_v38, %v2400_v20  ;;  %v2746_v53 = vsub.f32 %v2602_v50, %v2634_v35 }
  0x3b   :  { %v417_v43 = vand.u32 4294901760, %v416_v59  ;;  %v305_v26 = vand.u32 4294901760, %v304_v27  ;;  %v311_v59 = vsub.f32 %v2693_v47, %v3629_v18  ;;  %v3637_v3 = vand.u32 4294901760, %v2725_v19  ;;  %1896 = vmatprep.subr.mxu0 %v2703_v42 }
  0x3c   :  { %v2738_v27 = vsub.f32 %v2591_v54, %v2623_v25  ;;  %v2750_v18 = vsub.f32 %v2615_v40, %v2647_v52  ;;  %1897 = vmatpush3.msra.mxu0 %v2721_v2  ;;  %v3641_v50 = vand.u32 4294901760, %v2746_v53 }
  0x3d   :  { %1919 = vmatprep.subr.mxu1 %v417_v43  ;;  %v312_v4 = vand.u32 4294901760, %v311_v59  ;;  %v430_v43 = vsub.f32 %v2712_v44, %v3630_v11  ;;  %v318_v54 = vsub.f32 %v2725_v19, %v3637_v3  ;;  %v2756_v59 = vand.u32 4294901760, %v111_v13  ;;  %1936 = vmatprep.subr.mxu0 %v2411_v24 }
  0x3e   :  { %1920 = vmatpush3.msra.mxu1 %v305_v26  ;;  %v119_v26 = vcombine.high %v111_v13, %v111_v13  ;;  %v3640_v11 = vand.u32 4294901760, %v2738_v27  ;;  %v3642_v40 = vand.u32 4294901760, %v2750_v18 }
  0x3f   :  { %1921 = vmatprep.subr.mxu1 %v424_v61  ;;  %3751 = vst [vmem:[#allocation31_spill] sm:$0xff] %v2756_v59  ;;  %v431_v25 = vand.u32 4294901760, %v430_v43  ;;  %v2764_v61 = vsub.f32 %v2625_v39, %v2659_v45  ;;  %v319_v52 = vand.u32 4294901760, %v318_v54  ;;  %v325_v43 = vsub.f32 %v2746_v53, %v3641_v50 }
  0x40   :  { %1922 = vmatpush3.msra.mxu1 %v312_v4  ;;  %v2766_v35 = vand.u32 4294901760, %v119_v26  ;;  %v437_v3 = vsub.f32 %v2738_v27, %v3640_v11  ;;  %v2772_v4 = vsub.f32 %v111_v13, %v2756_v59  ;;  %v444_v39 = vsub.f32 %v2750_v18, %v3642_v40 }
  0x41   :  { %1923 = vmatprep.subr.mxu1 %v431_v25  ;;  %v3646_v54 = vand.u32 4294901760, %v2764_v61  ;;  %v2783_v45 = vsub.f32 %v2636_v60, %v2670_v32  ;;  %v2791_v50 = vsub.f32 %v2661_v57, %v2689_v34  ;;  %v326_v40 = vand.u32 4294901760, %v325_v43 }
  0x42   :  { %3752 = vst [vmem:[#allocation32_spill] sm:$0xff] %v2766_v35  ;;  %1924 = vmatpush3.msra.mxu1 %v319_v52  ;;  %v2786_v11 = vsub.f32 %v119_v26, %v2766_v35  ;;  %v438_v13 = vand.u32 4294901760, %v437_v3  ;;  %v3647_v25 = vand.u32 4294901760, %v2772_v4  ;;  %462 = vmatprep.mubr.f32.mxu1 %v2766_v35  ;;  %v445_v24 = vand.u32 4294901760, %v444_v39 }
  0x43   :  { %v332_v60 = vsub.f32 %v2764_v61, %v3646_v54  ;;  %v3648_v52 = vand.u32 4294901760, %v2783_v45  ;;  %v3653_v57 = vand.u32 4294901760, %v2791_v50  ;;  %v2805_v35 = vsub.f32 %v2672_v62, %v2703_v42 }
  0x44   :  { %v3656_v26 = vand.u32 4294901760, %v2786_v11  ;;  %1925 = vmatprep.subr.mxu1 %v438_v13  ;;  %v230_v3 = vsub.f32 %v2772_v4, %v3647_v25  ;;  %v2812_v54 = vsub.f32 %v2695_v56, %v2721_v2 }
  0x45   :  { %1926 = vmatpush3.msra.mxu1 %v326_v40  ;;  %v333_v43 = vand.u32 4294901760, %v332_v60  ;;  %v451_v39 = vsub.f32 %v2783_v45, %v3648_v52  ;;  %v339_v62 = vsub.f32 %v2791_v50, %v3653_v57  ;;  %v3655_v40 = vand.u32 4294901760, %v2805_v35 }
  0x46   :  { %v224_v13 = vsub.f32 %v2786_v11, %v3656_v26  ;;  %1927 = vmatprep.subr.mxu1 %v445_v24  ;;  %v231_v60 = vand.u32 4294901760, %v230_v3  ;;  %v3654_v52 = vand.u32 4294901760, %v2812_v54  ;;  %v3767_v26 = vld [vmem:[#allocation23_spill] sm:$0xff] }
  0x47   :  { %1928 = vmatpush3.msra.mxu1 %v333_v43  ;;  %v452_v25 = vand.u32 4294901760, %v451_v39  ;;  %v340_v34 = vand.u32 4294901760, %v339_v62  ;;  %v458_v56 = vsub.f32 %v2805_v35, %v3655_v40  ;;  %v3757_v43 = vld [vmem:[#allocation14_spill] sm:$0xff]  ;;  %v3758_v39 = vld [vmem:[#allocation15_spill] sm:$0xff]  ;;  %v3760_v62 = vld [vmem:[#allocation17_spill] sm:$0xff] }
  0x48   :  { %v225_v42 = vand.u32 4294901760, %v224_v13  ;;  %v346_v24 = vsub.f32 %v2812_v54, %v3654_v52  ;;  %v3759_v13 = vld [vmem:[#allocation16_spill] sm:$0xff]  ;;  %v3764_v52 = vld [vmem:[#allocation21_spill] sm:$0xff]  ;;  %v3765_v40 = vld [vmem:[#allocation22_spill] sm:$0xff] }
  0x49   :  { %1929 = vmatprep.subr.mxu1 %v452_v25  ;;  %v459_v57 = vand.u32 4294901760, %v458_v56  ;;  %v3755_v25 = vld [vmem:[#allocation13_spill] sm:$0xff]  ;;  %v3762_v56 = vld [vmem:[#allocation19_spill] sm:$0xff] }
  0x4a   :  { %226 = vmatprep.mubr.f32.mxu0 %v225_v42  ;;  %1930 = vmatpush3.msra.mxu1 %v340_v34  ;;  %v347_v3 = vand.u32 4294901760, %v346_v24  ;;  %v3753_v42 = vld [vmem:[#allocation12_spill] sm:$0xff]  ;;  %v3754_v34 = vld [vmem:[#allocation25_spill] sm:$0xff]  ;;  %v104_v24 = vcombine.high %v2714_v38, %v2714_v38 }
  0x4b   :  { %232 = vmatmul.mubr.f32.vlgmr.msra.gmra.mxu0 %v231_v60  ;;  %1931 = vmatprep.subr.mxu1 %v459_v57  ;;  %v3756_v57 = vld [vmem:[#allocation27_spill] sm:$0xff]  ;;  %v3761_v60 = vld [vmem:[#allocation18_spill] sm:$0xff] }
  0x4c   :  { %1937 = vmatpush3.msra.mxu0 %v2424_v29  ;;  %1932 = vmatpush3.msra.mxu1 %v347_v3  ;;  %v3763_v3 = vld [vmem:[#allocation20_spill] sm:$0xff]  ;;  %v2885_v38 = vrot.slane %v104_v24, %v2400_v20  ;;  %v3772_v20 = vand.u32 4294901760, %v2424_v29  ;;  %v3779_v29 = vand.u32 4294901760, %v2466_v46 }
  0x4d   :  { %1938 = vmatprep.subr.mxu0 %v2430_v31  ;;  %464 = vmatmul.mubr.f32.vlgmr.msra.gmra.mxu1 %v2756_v59  ;;  %v3768_v59 = vld [vmem:[#allocation24_spill] sm:$0xff] }
  0x4e   :  { %1939 = vmatpush3.msra.mxu0 %v2444_v37  ;;  %1971 = vmatprep.subr.mxu1 %v2386_v8  ;;  %3766 = vst [vmem:[#allocation12_spill] sm:$0xff] %v2885_v38  ;;  %v3773_v24 = vld [vmem:[#allocation28_spill] sm:$0xff]  ;;  %v3774_v38 = vand.u32 4294901760, %v2430_v31  ;;  %v3780_v31 = vand.u32 4294901760, %v2480_v51 }
  0x4f   :  { %1940 = vmatprep.subr.mxu0 %v2453_v41  ;;  %1972 = vmatpush3.msra.mxu1 %v2388_v9 }
  0x50   :  { %1941 = vmatpush3.msra.mxu0 %v2466_v46  ;;  %1973 = vmatprep.subr.mxu1 %v2390_v10  ;;  %v3785_v46 = vand.u32 4294901760, %v2530_v17 }
  0x51   :  { %1942 = vmatprep.subr.mxu0 %v2480_v51  ;;  %1974 = vmatpush3.msra.mxu1 %v2392_v14  ;;  %v3786_v51 = vand.u32 4294901760, %v2541_v49 }
  0x52   :  { %1943 = vmatpush3.msra.mxu0 %v2506_v1  ;;  %1975 = vmatprep.subr.mxu1 %v2394_v15 }
  0x53   :  { %1944 = vmatprep.subr.mxu0 %v2519_v6  ;;  %1976 = vmatpush3.msra.mxu1 %v2396_v16 }
  0x54   :  { %1945 = vmatpush3.msra.mxu0 %v2530_v17  ;;  %1977 = vmatprep.subr.mxu1 %v2403_v21  ;;  %v3789_v17 = vand.u32 4294901760, %v2579_v48 }
  0x55   :  { %1946 = vmatprep.subr.mxu0 %v2541_v49  ;;  %1978 = vmatpush3.msra.mxu1 %v2405_v22  ;;  %v85_v49 = vld [vmem:[#allocation5 + $0x170] sm:$0xff] }
  0x56   :  { %1947 = vmatpush3.msra.mxu0 %v2553_v58  ;;  %1979 = vmatprep.subr.mxu1 %v2408_v23 }
  0x57   :  { %1948 = vmatprep.subr.mxu0 %v2567_v0  ;;  %1980 = vmatpush3.msra.mxu1 %v2421_v28 }
  0x58   :  { %1949 = vmatpush3.msra.mxu0 %v2579_v48  ;;  %1981 = vmatprep.subr.mxu1 %v2427_v30  ;;  %v101_v48 = vld [vmem:[#allocation5 + $0x1f0] sm:$0xff] }
  0x59   :  { %1950 = vmatprep.subr.mxu0 %v2600_v63  ;;  %1982 = vmatpush3.msra.mxu1 %v2441_v36 }
  0x5a   :  { %1951 = vmatpush3.msra.mxu0 %v2613_v12  ;;  %1983 = vmatprep.subr.mxu1 %v3753_v42 }
  0x5b   :  { %1952 = vmatprep.subr.mxu0 %v2631_v55  ;;  %1984 = vmatpush3.msra.mxu1 %v3755_v25 }
  0x5c   :  { %1953 = vmatpush3.msra.mxu0 %v3754_v34  ;;  %1985 = vmatprep.subr.mxu1 %v3757_v43 }
  0x5d   :  { %1954 = vmatprep.subr.mxu0 %v3756_v57  ;;  %1986 = vmatpush3.msra.mxu1 %v3758_v39 }
  0x5e   :  { %1955 = vmatpush3.msra.mxu0 %v2667_v33  ;;  %1987 = vmatprep.subr.mxu1 %v3759_v13 }
  0x5f   :  { %1956 = vmatprep.subr.mxu0 %v2681_v7  ;;  %1988 = vmatpush3.msra.mxu1 %v3760_v62 }
  0x60   :  { %1957 = vmatpush3.msra.mxu0 %v2693_v47  ;;  %1989 = vmatprep.subr.mxu1 %v3761_v60 }
  0x61   :  { %1958 = vmatprep.subr.mxu0 %v2712_v44  ;;  %1990 = vmatpush3.msra.mxu1 %v3762_v56 }
  0x62   :  { %1959 = vmatpush3.msra.mxu0 %v2725_v19  ;;  %1991 = vmatprep.subr.mxu1 %v3763_v3 }
  0x63   :  { %1960 = vmatprep.subr.mxu0 %v2738_v27  ;;  %1992 = vmatpush3.msra.mxu1 %v3764_v52  ;;  %v3770_v52 = vld [vmem:[#allocation11_spill] sm:$0xff] }
  0x64   :  { %1961 = vmatpush3.msra.mxu0 %v2746_v53  ;;  %1993 = vmatprep.subr.mxu1 %v3765_v40  ;;  %v3769_v40 = vld [vmem:[#allocation26_spill] sm:$0xff]  ;;  %v3771_v3 = vand.u32 4294901760, %v3770_v52 }
  0x65   :  { %1962 = vmatprep.subr.mxu0 %v2750_v18  ;;  %599 = vmatprep.mubr.f32.mxu0 %v2786_v11  ;;  %v3778_v52 = vld [vmem:[#allocation30_spill] sm:$0xff] }
  0x66   :  { %1963 = vmatpush3.msra.mxu0 %v2764_v61  ;;  %1994 = vmatpush3.msra.mxu1 %v2609_v5 }
  0x67   :  { %1964 = vmatprep.subr.mxu0 %v2783_v45  ;;  %1995 = vmatprep.subr.mxu1 %v3767_v26  ;;  %v3776_v26 = vld [vmem:[#allocation29_spill] sm:$0xff] }
  0x68   :  { %1965 = vmatpush3.msra.mxu0 %v2791_v50  ;;  %1996 = vmatpush3.msra.mxu1 %v3768_v59  ;;  %v3775_v59 = vand.u32 4294901760, %v2444_v37  ;;  %v3782_v37 = vand.u32 4294901760, %v2506_v1  ;;  %v3787_v1 = vand.u32 4294901760, %v2553_v58 }
  0x69   :  { %1966 = vmatprep.subr.mxu0 %v2805_v35  ;;  %1997 = vmatprep.subr.mxu1 %v3769_v40  ;;  %v3777_v40 = vand.u32 4294901760, %v2453_v41  ;;  %v3784_v41 = vand.u32 4294901760, %v2519_v6  ;;  %v3788_v6 = vand.u32 4294901760, %v2567_v0  ;;  %v2950_v0 = vand.u32 4294901760, %v85_v49 }
  0x6a   :  { %1967 = vmatpush3.msra.mxu0 %v2812_v54  ;;  %1998 = vmatpush3.msra.mxu1 %v3773_v24 }
  0x6b   :  { %602 = vmatmul.mubr.f32.vlgmr.msra.gmra.mxu0 %v2772_v4  ;;  %2006 = vmatprep.subr.mxu0 %v3771_v3  ;;  %v3781_v3 = vand.u32 4294901760, %v2786_v11  ;;  %3793 = vst [vmem:[#allocation25_spill] sm:$0xff] %v2950_v0  ;;  %v2964_v11 = vand.u32 4294901760, %v101_v48 }
  0x6c   :  { %2007 = vmatpush3.msra.mxu0 %v3772_v20  ;;  %1999 = vmatprep.subr.mxu1 %v2670_v32  ;;  %v98_v20 = vld [vmem:[#allocation5 + $0x1d8] sm:$0xff] }
  0x6d   :  { %2008 = vmatprep.subr.mxu0 %v3774_v38  ;;  %2000 = vmatpush3.msra.mxu1 %v3776_v26  ;;  %v3803_v38 = vand.u32 4294901760, %v2725_v19  ;;  %v97_v19 = vld [vmem:[#allocation5 + $0x1d0] sm:$0xff] }
  0x6e   :  { %2009 = vmatpush3.msra.mxu0 %v3775_v59  ;;  %2001 = vmatprep.subr.mxu1 %v3778_v52  ;;  %v3783_v59 = vand.u32 4294901760, %v2772_v4  ;;  %v83_v4 = vld [vmem:[#allocation5 + $0x160] sm:$0xff] }
  0x6f   :  { %2010 = vmatprep.subr.mxu0 %v3777_v40  ;;  %2002 = vmatpush3.msra.mxu1 %v2721_v2  ;;  %v2970_v40 = vsub.f32 %v85_v49, %v2950_v0 }
  0x70   :  { %2011 = vmatpush3.msra.mxu0 %v3779_v29  ;;  %706 = vmatprep.mubr.f32.mxu1 %v3781_v3  ;;  %v81_v3 = vld [vmem:[#allocation5 + $0x150] sm:$0xff] }
  0x71   :  { %2012 = vmatprep.subr.mxu0 %v3780_v31  ;;  %710 = vmatmul.mubr.f32.vlgmr.msra.gmra.mxu1 %v3783_v59  ;;  %v3804_v31 = vand.u32 4294901760, %v2738_v27  ;;  %v3806_v59 = vand.u32 4294901760, %v2746_v53  ;;  %v3810_v53 = vand.u32 4294901760, %v2764_v61 }
  0x72   :  { %2013 = vmatpush3.msra.mxu0 %v3782_v37  ;;  %2041 = vmatprep.subr.mxu1 %v2386_v8  ;;  %v86_v8 = vld [vmem:[#allocation5 + $0x178] sm:$0xff] }
  0x73   :  { %2014 = vmatprep.subr.mxu0 %v3784_v41  ;;  %2042 = vmatpush3.msra.mxu1 %v2388_v9  ;;  %v102_v9 = vld [vmem:[#allocation5 + $0x1f8] sm:$0xff]  ;;  %v2943_v58 = vand.u32 4294901760, %v86_v8 }
  0x74   :  { %2015 = vmatpush3.msra.mxu0 %v3785_v46  ;;  %2043 = vmatprep.subr.mxu1 %v2390_v10  ;;  %v3790_v10 = vand.u32 4294901760, %v2600_v63  ;;  %v3794_v63 = vand.u32 4294901760, %v3754_v34  ;;  %v3016_v46 = vand.u32 4294901760, %v98_v20 }
  0x75   :  { %2016 = vmatprep.subr.mxu0 %v3786_v51  ;;  %2044 = vmatpush3.msra.mxu1 %v2392_v14  ;;  %v3791_v14 = vand.u32 4294901760, %v2613_v12  ;;  %v84_v12 = vld [vmem:[#allocation5 + $0x168] sm:$0xff] }
  0x76   :  { %2017 = vmatpush3.msra.mxu0 %v3787_v1  ;;  %2045 = vmatprep.subr.mxu1 %v2394_v15  ;;  %v3792_v15 = vand.u32 4294901760, %v2631_v55  ;;  %v3796_v55 = vand.u32 4294901760, %v2667_v33  ;;  %v2980_v34 = vand.u32 4294901760, %v84_v12  ;;  %3808 = vst [vmem:[#allocation16_spill] sm:$0xff] %v3016_v46  ;;  %v80_v1 = vld [vmem:[#allocation5 + $0x148] sm:$0xff] }
  0x77   :  { %2018 = vmatprep.subr.mxu0 %v3788_v6  ;;  %2046 = vmatpush3.msra.mxu1 %v2396_v16  ;;  %v2948_v16 = vand.u32 4294901760, %v102_v9  ;;  %v3031_v6 = vand.u32 4294901760, %v81_v3 }
  0x78   :  { %2019 = vmatpush3.msra.mxu0 %v3789_v17  ;;  %2047 = vmatprep.subr.mxu1 %v2403_v21  ;;  %v100_v21 = vld [vmem:[#allocation5 + $0x1e8] sm:$0xff]  ;;  %3800 = vst [vmem:[#allocation27_spill] sm:$0xff] %v2980_v34  ;;  %v3008_v27 = vsub.f32 %v84_v12, %v2980_v34  ;;  %v3813_v17 = vand.u32 4294901760, %v2783_v45  ;;  %v3815_v45 = vand.u32 4294901760, %v2791_v50 }
  0x79   :  { %2020 = vmatprep.subr.mxu0 %v3790_v10  ;;  %2048 = vmatpush3.msra.mxu1 %v2405_v22  ;;  %v3795_v22 = vand.u32 4294901760, %v3756_v57  ;;  %v2975_v33 = vsub.f32 %v102_v9, %v2948_v16  ;;  %v99_v57 = vld [vmem:[#allocation5 + $0x1e0] sm:$0xff]  ;;  %3812 = vst [vmem:[#allocation19_spill] sm:$0xff] %v3031_v6  ;;  %v3814_v9 = vld [vmem:[#allocation20_spill] sm:$0xff] }
  0x7a   :  { %2021 = vmatpush3.msra.mxu0 %v3791_v14  ;;  %2049 = vmatprep.subr.mxu1 %v2408_v23  ;;  %v2962_v23 = vsub.f32 %v86_v8, %v2943_v58  ;;  %v96_v8 = vld [vmem:[#allocation5 + $0x1c8] sm:$0xff]  ;;  %v3816_v14 = vld [vmem:[#allocation21_spill] sm:$0xff] }
  0x7b   :  { %2022 = vmatprep.subr.mxu0 %v3792_v15  ;;  %2050 = vmatpush3.msra.mxu1 %v2421_v28  ;;  %v3797_v28 = vand.u32 4294901760, %v2681_v7  ;;  %v3801_v7 = vand.u32 4294901760, %v2712_v44  ;;  %v2997_v44 = vand.u32 4294901760, %v99_v57  ;;  %v3053_v15 = vand.u32 4294901760, %v80_v1 }
  0x7c   :  { %2023 = vmatpush3.msra.mxu0 %v3794_v63  ;;  %2051 = vmatprep.subr.mxu1 %v2427_v30  ;;  %v2972_v30 = vand.u32 4294901760, %v100_v21  ;;  %v3665_v29 = vand.u32 4294901760, %v2962_v23  ;;  %v3818_v63 = vand.u32 4294901760, %v2805_v35  ;;  %v3062_v12 = vand.u32 4294901760, %v96_v8 }
  0x7d   :  { %2024 = vmatprep.subr.mxu0 %v3795_v22  ;;  %2052 = vmatpush3.msra.mxu1 %v2441_v36  ;;  %v3799_v36 = vand.u32 4294901760, %v2693_v47  ;;  %v82_v47 = vld [vmem:[#allocation5 + $0x158] sm:$0xff]  ;;  %3805 = vst [vmem:[#allocation15_spill] sm:$0xff] %v2997_v44  ;;  %v3048_v10 = vsub.f32 %v99_v57, %v2997_v44  ;;  %3817 = vst [vmem:[#allocation11_spill] sm:$0xff] %v3053_v15  ;;  %v3822_v57 = vld [vmem:[#allocation32_spill] sm:$0xff] }
  0x7e   :  { %2025 = vmatpush3.msra.mxu0 %v3796_v55  ;;  %2053 = vmatprep.subr.mxu1 %v3753_v42  ;;  %3798 = vst [vmem:[#allocation13_spill] sm:$0xff] %v2972_v30  ;;  %v2985_v42 = vand.u32 4294901760, %v83_v4  ;;  %v3002_v37 = vsub.f32 %v100_v21, %v2972_v30  ;;  %v3018_v51 = vand.u32 4294901760, %v82_v47  ;;  %v3819_v21 = vld [vmem:[#allocation22_spill] sm:$0xff]  ;;  %3820 = vst [vmem:[#allocation28_spill] sm:$0xff] %v3062_v12 }
  0x7f   :  { %2026 = vmatprep.subr.mxu0 %v3797_v28  ;;  %2054 = vmatpush3.msra.mxu1 %v3755_v25  ;;  %v2992_v25 = vsub.f32 %v101_v48, %v2964_v11  ;;  %v3660_v48 = vand.u32 4294901760, %v3008_v27  ;;  %v95_v55 = vld [vmem:[#allocation5 + $0x1c0] sm:$0xff]  ;;  %v3066_v28 = vsub.f32 %v98_v20, %v3016_v46  ;;  %v3838_v20 = vld [vmem:[#allocation12_spill] sm:$0xff] }
  0x80   :  { %2027 = vmatpush3.msra.mxu0 %v3799_v36  ;;  %2055 = vmatprep.subr.mxu1 %v3757_v43  ;;  %3802 = vst [vmem:[#allocation14_spill] sm:$0xff] %v2985_v42  ;;  %v3666_v43 = vand.u32 4294901760, %v2975_v33  ;;  %v3014_v41 = vsub.f32 %v83_v4, %v2985_v42  ;;  %3809 = vst [vmem:[#allocation17_spill] sm:$0xff] %v3018_v51  ;;  %v3661_v49 = vand.u32 4294901760, %v3002_v37  ;;  %v79_v4 = vld [vmem:[#allocation5 + $0x140] sm:$0xff]  ;;  %v3821_v36 = vand.u32 4294901760, %v2812_v54 }
  0x81   :  { %2028 = vmatprep.subr.mxu0 %v3801_v7  ;;  %2056 = vmatpush3.msra.mxu1 %v3758_v39  ;;  %v3662_v39 = vand.u32 4294901760, %v2970_v40  ;;  %v3060_v22 = vsub.f32 %v82_v47, %v3018_v51  ;;  %v78_v47 = vld [vmem:[#allocation5 + $0x138] sm:$0xff]  ;;  %v3823_v54 = vld [vmem:[#allocation31_spill] sm:$0xff] }
  0x82   :  { %2029 = vmatpush3.msra.mxu0 %v3803_v38  ;;  %2057 = vmatprep.subr.mxu1 %v3759_v13  ;;  %v3807_v13 = vand.u32 4294901760, %v2750_v18  ;;  %v3026_v18 = vsub.f32 %v2962_v23, %v3665_v29  ;;  %v3039_v61 = vsub.f32 %v2975_v33, %v3666_v43  ;;  %v3664_v50 = vand.u32 4294901760, %v3014_v41 }
  0x83   :  { %2030 = vmatprep.subr.mxu0 %v3804_v31  ;;  %2058 = vmatpush3.msra.mxu1 %v3760_v62  ;;  %v3028_v62 = vand.u32 4294901760, %v97_v19  ;;  %v3078_v38 = vsub.f32 %v81_v3, %v3031_v6  ;;  %v3667_v3 = vand.u32 4294901760, %v3048_v10 }
  0x84   :  { %2031 = vmatpush3.msra.mxu0 %v3806_v59  ;;  %2059 = vmatprep.subr.mxu1 %v3761_v60  ;;  %v3663_v60 = vand.u32 4294901760, %v2992_v25  ;;  %v76_v59 = vld [vmem:[#allocation5 + $0x128] sm:$0xff] }
  0x85   :  { %2032 = vmatprep.subr.mxu0 %v3807_v13  ;;  %2060 = vmatpush3.msra.mxu1 %v3762_v56  ;;  %3811 = vst [vmem:[#allocation18_spill] sm:$0xff] %v3028_v62  ;;  %v3044_v56 = vsub.f32 %v2970_v40, %v3662_v39  ;;  %v3081_v31 = vsub.f32 %v97_v19, %v3028_v62 }
  0x86   :  { %2033 = vmatpush3.msra.mxu0 %v3810_v53  ;;  %2061 = vmatprep.subr.mxu1 %v3814_v9  ;;  %v3075_v7 = vsub.f32 %v2992_v25, %v3663_v60  ;;  %v3090_v13 = vsub.f32 %v3002_v37, %v3661_v49  ;;  %v77_v53 = vld [vmem:[#allocation5 + $0x130] sm:$0xff]  ;;  %v3101_v19 = vsub.f32 %v3008_v27, %v3660_v48  ;;  %v3103_v9 = vand.u32 4294901760, %v95_v55  ;;  %v3830_v49 = vld [vmem:[#allocation26_spill] sm:$0xff] }
  0x87   :  { %2034 = vmatprep.subr.mxu0 %v3813_v17  ;;  %2062 = vmatpush3.msra.mxu1 %v3816_v14  ;;  %v3824_v17 = vld [vmem:[#allocation23_spill] sm:$0xff]  ;;  %v94_v14 = vld [vmem:[#allocation5 + $0x1b8] sm:$0xff]  ;;  %v3118_v48 = vld [vmem:[#allocation5 + $0x1b0] sm:$0xff]  ;;  %v3670_v39 = vand.u32 4294901760, %v3081_v31  ;;  %v3124_v60 = vand.u32 4294901760, %v77_v53 }
  0x88   :  { %2035 = vmatpush3.msra.mxu0 %v3815_v45  ;;  %2063 = vmatprep.subr.mxu1 %v3819_v21  ;;  %3826 = vst [vmem:[#allocation30_spill] sm:$0xff] %v3103_v9  ;;  %v3105_v45 = vand.u32 4294901760, %v79_v4  ;;  %v3112_v21 = vsub.f32 %v3014_v41, %v3664_v50  ;;  %v3127_v50 = vsub.f32 %v96_v8, %v3062_v12  ;;  %v3137_v43 = vand.u32 4294901760, %v94_v14 }
  0x89   :  { %2036 = vmatprep.subr.mxu0 %v3818_v63  ;;  %876 = vmatprep.mubr.f32.mxu0 %v3822_v57  ;;  %v3828_v63 = vld [vmem:[#allocation24_spill] sm:$0xff]  ;;  %3831 = vst [vmem:[#allocation22_spill] sm:$0xff] %v3124_v60  ;;  %v3147_v29 = vand.u32 4294901760, %v3118_v48 }
  0x8a   :  { %2037 = vmatpush3.msra.mxu0 %v3821_v36  ;;  %2064 = vmatpush3.msra.mxu1 %v2609_v5  ;;  %v3096_v5 = vsub.f32 %v80_v1, %v3053_v15  ;;  %3827 = vst [vmem:[#allocation20_spill] sm:$0xff] %v3105_v45  ;;  %v3668_v1 = vand.u32 4294901760, %v3066_v28  ;;  %v3115_v36 = vand.u32 4294901760, %v78_v47  ;;  %3832 = vst [vmem:[#allocation32_spill] sm:$0xff] %v3137_v43 }
  0x8b   :  { %878 = vmatmul.mubr.f32.vlgmr.msra.gmra.mxu0 %v3823_v54  ;;  %2065 = vmatprep.subr.mxu1 %v3824_v17  ;;  %v3669_v17 = vand.u32 4294901760, %v3060_v22  ;;  %3834 = vst [vmem:[#allocation23_spill] sm:$0xff] %v3147_v29 }
  0x8c   :  { %2076 = vmatprep.subr.mxu0 %v2948_v16  ;;  %3825 = vst [vmem:[#allocation29_spill] sm:$0xff] %v3096_v5  ;;  %2066 = vmatpush3.msra.mxu1 %v3828_v63  ;;  %3829 = vst [vmem:[#allocation21_spill] sm:$0xff] %v3115_v36  ;;  %v1223_v63 = vand.u32 4294901760, %v3075_v7  ;;  %v3673_v7 = vand.u32 4294901760, %v3078_v38  ;;  %v3158_v8 = vsub.f32 %v3066_v28, %v3668_v1 }
  0x8d   :  { %2077 = vmatpush3.msra.mxu0 %v2943_v58  ;;  %2067 = vmatprep.subr.mxu1 %v3830_v49  ;;  %v3135_v49 = vsub.f32 %v3048_v10, %v3667_v3  ;;  %v3150_v3 = vsub.f32 %v95_v55, %v3103_v9  ;;  %v3166_v35 = vsub.f32 %v3060_v22, %v3669_v17  ;;  %v75_v55 = vld [vmem:[#allocation5 + $0x120] sm:$0xff] }
  0x8e   :  { %2078 = vmatprep.subr.mxu0 %v2964_v11  ;;  %2068 = vmatpush3.msra.mxu1 %v3773_v24  ;;  %v3144_v24 = vsub.f32 %v79_v4, %v3105_v45  ;;  %v3161_v4 = vsub.f32 %v78_v47, %v3115_v36  ;;  %v3176_v1 = vsub.f32 %v77_v53, %v3124_v60  ;;  %v92_v47 = vld [vmem:[#allocation5 + $0x1a8] sm:$0xff]  ;;  %v91_v17 = vld [vmem:[#allocation5 + $0x1a0] sm:$0xff] }
  0x8f   :  { %2079 = vmatpush3.msra.mxu0 %v2950_v0  ;;  %2069 = vmatprep.subr.mxu1 %v2670_v32  ;;  %3835 = vst [vmem:[#allocation24_spill] sm:$0xff] %v3150_v3  ;;  %v3191_v53 = vsub.f32 %v94_v14, %v3137_v43  ;;  %v74_v32 = vld [vmem:[#allocation5 + $0x118] sm:$0xff]  ;;  %v1244_v14 = vand.u32 4294901760, %v3158_v8 }
  0x90   :  { %2080 = vmatprep.subr.mxu0 %v2972_v30  ;;  %3833 = vst [vmem:[#allocation31_spill] sm:$0xff] %v3144_v24  ;;  %2070 = vmatpush3.msra.mxu1 %v3776_v26  ;;  %v3173_v26 = vsub.f32 %v3081_v31, %v3670_v39  ;;  %v3186_v39 = vsub.f32 %v3078_v38, %v3673_v7  ;;  %v3206_v30 = vand.u32 4294901760, %v92_v47  ;;  %v90_v8 = vld [vmem:[#allocation5 + $0x198] sm:$0xff]  ;;  %v3224_v0 = vand.u32 4294901760, %v74_v32 }
  0x91   :  { %2081 = vmatpush3.msra.mxu0 %v2980_v34  ;;  %2071 = vmatprep.subr.mxu1 %v3778_v52  ;;  %v1237_v52 = vand.u32 4294901760, %v3135_v49  ;;  %v120_v7 = vcombine.high %v3838_v20, %v3838_v20  ;;  %v3839_v34 = vand.u32 4294901760, %v3039_v61  ;;  %v3841_v49 = vand.u32 4294901760, %v3026_v18 }
  0x92   :  { %2082 = vmatprep.subr.mxu0 %v2997_v44  ;;  %2072 = vmatpush3.msra.mxu1 %v2721_v2  ;;  %v3188_v44 = vand.u32 4294901760, %v76_v59  ;;  %3840 = vst [vmem:[#allocation12_spill] sm:$0xff] %v3206_v30  ;;  %v1251_v2 = vand.u32 4294901760, %v3173_v26  ;;  %v1139_v18 = vand.u32 4294901760, %v3186_v39 }
  0x93   :  { %980 = vmatprep.mubr.f32.mxu1 %v3822_v57  ;;  %2083 = vmatpush3.msra.mxu0 %v2985_v42  ;;  %v3196_v57 = vand.u32 4294901760, %v75_v55  ;;  %v1132_v42 = vand.u32 4294901760, %v3166_v35 }
  0x94   :  { %3836 = vst [vmem:[#allocation26_spill] sm:$0xff] %v3188_v44  ;;  %982 = vmatmul.mubr.f32.vlgmr.msra.gmra.mxu1 %v3823_v54  ;;  %2084 = vmatprep.subr.mxu0 %v3016_v46  ;;  %v3208_v54 = vand.u32 4294901760, %v91_v17  ;;  %v3842_v46 = vand.u32 4294901760, %v3127_v50  ;;  %v3229_v26 = vsub.f32 %v76_v59, %v3188_v44  ;;  %v3846_v59 = vand.u32 4294901760, %v3144_v24 }
  0x95   :  { %3837 = vst [vmem:[#allocation33_spill] sm:$0xff] %v3196_v57  ;;  %2111 = vmatprep.subr.mxu1 %v3839_v34  ;;  %2085 = vmatpush3.msra.mxu0 %v3018_v51  ;;  %v3843_v34 = vand.u32 4294901760, %v3096_v5  ;;  %v73_v51 = vld [vmem:[#allocation5 + $0x110] sm:$0xff]  ;;  %v3245_v39 = vsub.f32 %v75_v55, %v3196_v57  ;;  %v3261_v55 = vsub.f32 %v92_v47, %v3206_v30  ;;  %v3851_v47 = vand.u32 4294901760, %v3191_v53 }
  0x96   :  { %2112 = vmatpush3.msra.mxu1 %v3841_v49  ;;  %v3217_v61 = vsub.f32 %v3127_v50, %v3842_v46  ;;  %2086 = vmatprep.subr.mxu0 %v3028_v62  ;;  %v3234_v46 = vsub.f32 %v3118_v48, %v3147_v29  ;;  %v3845_v62 = vand.u32 4294901760, %v3150_v3  ;;  %v3250_v49 = vsub.f32 %v3144_v24, %v3846_v59  ;;  %v88_v24 = vld [vmem:[#allocation5 + $0x188] sm:$0xff] }
  0x97   :  { %v3222_v35 = vsub.f32 %v3096_v5, %v3843_v34  ;;  %2113 = vmatprep.subr.mxu1 %v1223_v63  ;;  %2087 = vmatpush3.msra.mxu0 %v3031_v6  ;;  %v3844_v34 = vand.u32 4294901760, %v3044_v56  ;;  %v3252_v48 = vand.u32 4294901760, %v120_v7  ;;  %v3848_v56 = vand.u32 4294901760, %v3090_v13  ;;  %v89_v6 = vld [vmem:[#allocation5 + $0x190] sm:$0xff] }
  0x98   :  { %v3242_v63 = vsub.f32 %v3150_v3, %v3845_v62  ;;  %2088 = vmatprep.subr.mxu0 %v3062_v12  ;;  %v3264_v3 = vand.u32 4294901760, %v3838_v20  ;;  %v3850_v59 = vand.u32 4294901760, %v3101_v19  ;;  %v1258_v12 = vand.u32 4294901760, %v3217_v61  ;;  %v72_v61 = vld [vmem:[#allocation5 + $0x108] sm:$0xff] }
  0x99   :  { %2114 = vmatpush3.msra.mxu1 %v3844_v34  ;;  %3847 = vst [vmem:[#allocation34_spill] sm:$0xff] %v3252_v48  ;;  %v3257_v34 = vand.u32 4294901760, %v90_v8  ;;  %2089 = vmatpush3.msra.mxu0 %v3053_v15  ;;  %v1146_v13 = vand.u32 4294901760, %v3222_v35  ;;  %v3274_v62 = vand.u32 4294901760, %v73_v51  ;;  %v1271_v15 = vsub.f32 %v3191_v53, %v3851_v47 }
  0x9a   :  { %2115 = vmatprep.subr.mxu1 %v3848_v56  ;;  %3849 = vst [vmem:[#allocation35_spill] sm:$0xff] %v3264_v3  ;;  %v3272_v56 = vsub.f32 %v74_v32, %v3224_v0  ;;  %2090 = vmatprep.subr.mxu0 %v3103_v9  ;;  %v3283_v35 = vsub.f32 %v91_v17, %v3208_v54  ;;  %v3852_v32 = vand.u32 4294901760, %v3112_v21  ;;  %v1265_v9 = vand.u32 4294901760, %v3242_v63  ;;  %v71_v63 = vld [vmem:[#allocation5 + $0x100] sm:$0xff] }
  0x9b   :  { %2116 = vmatpush3.msra.mxu1 %v3850_v59  ;;  %2091 = vmatpush3.msra.mxu0 %v3105_v45  ;;  %v3290_v5 = vand.u32 4294901760, %v89_v6  ;;  %v3293_v47 = vsub.f32 %v120_v7, %v3252_v48  ;;  %v3854_v17 = vand.u32 4294901760, %v3161_v4  ;;  %v3299_v19 = vand.u32 4294901760, %v88_v24 }
  0x9c   :  { %2117 = vmatprep.subr.mxu1 %v1237_v52  ;;  %v1153_v52 = vand.u32 4294901760, %v3250_v49  ;;  %2092 = vmatprep.subr.mxu0 %v3137_v43  ;;  %v3304_v49 = vsub.f32 %v3838_v20, %v3264_v3  ;;  %v3308_v7 = vsub.f32 %v73_v51, %v3274_v62  ;;  %v3314_v43 = vsub.f32 %v90_v8, %v3257_v34 }
  0x9d   :  { %2118 = vmatpush3.msra.mxu1 %v3852_v32  ;;  %3853 = vst [vmem:[#allocation36_spill] sm:$0xff] %v3290_v5  ;;  %v1159_v59 = vsub.f32 %v3161_v4, %v3854_v17  ;;  %v87_v32 = vld [vmem:[#allocation5 + $0x180] sm:$0xff]  ;;  %2093 = vmatpush3.msra.mxu0 %v3115_v36  ;;  %v1272_v21 = vand.u32 4294901760, %v1271_v15  ;;  %v3855_v20 = vand.u32 4294901760, %v3234_v46  ;;  %v3327_v8 = vand.u32 4294901760, %v71_v63 }
  0x9e   :  { %2119 = vmatprep.subr.mxu1 %v1244_v14  ;;  %v3310_v14 = vand.u32 4294901760, %v72_v61  ;;  %2094 = vmatprep.subr.mxu0 %v3147_v29  ;;  %v3325_v17 = vand.u32 4294901760, %v87_v32  ;;  %v3331_v15 = vsub.f32 %v89_v6, %v3290_v5  ;;  %v3858_v6 = vand.u32 4294901760, %v3229_v26 }
  0x9f   :  { %2120 = vmatpush3.msra.mxu1 %v1132_v42  ;;  %v1278_v45 = vsub.f32 %v3234_v46, %v3855_v20  ;;  %v3856_v42 = vand.u32 4294901760, %v3176_v1  ;;  %2095 = vmatpush3.msra.mxu0 %v3124_v60  ;;  %v1160_v20 = vand.u32 4294901760, %v1159_v59  ;;  %v3348_v59 = vsub.f32 %v88_v24, %v3299_v19 }
  0xa0   :  { %2121 = vmatprep.subr.mxu1 %v1251_v2  ;;  %2096 = vmatprep.subr.mxu0 %v3206_v30  ;;  %v3341_v2 = vsub.f32 %v72_v61, %v3310_v14  ;;  %v1173_v30 = vsub.f32 %v3229_v26, %v3858_v6  ;;  %v3859_v60 = vand.u32 4294901760, %v3283_v35  ;;  %v3357_v6 = vsub.f32 %v71_v63, %v3327_v8 }
  0xa1   :  { %v1166_v51 = vsub.f32 %v3176_v1, %v3856_v42  ;;  %2122 = vmatpush3.msra.mxu1 %v1139_v18  ;;  %v3857_v42 = vand.u32 4294901760, %v3261_v55  ;;  %2097 = vmatpush3.msra.mxu0 %v3188_v44  ;;  %v3861_v24 = vand.u32 4294901760, %v3293_v47  ;;  %v3864_v63 = vand.u32 4294901760, %v3304_v49 }
  0xa2   :  { %2123 = vmatprep.subr.mxu1 %v1258_v12  ;;  %2098 = vmatprep.subr.mxu0 %v3208_v54  ;;  %3860 = vst [vmem:[#allocation37_spill] sm:$0xff] %v3357_v6 }
  0xa3   :  { %v1285_v36 = vsub.f32 %v3261_v55, %v3857_v42  ;;  %2124 = vmatpush3.msra.mxu1 %v1146_v13  ;;  %v1279_v42 = vand.u32 4294901760, %v1278_v45  ;;  %v1167_v18 = vand.u32 4294901760, %v1166_v51  ;;  %v1292_v13 = vsub.f32 %v3283_v35, %v3859_v60  ;;  %2099 = vmatpush3.msra.mxu0 %v3196_v57 }
  0xa4   :  { %2125 = vmatprep.subr.mxu1 %v1265_v9  ;;  %v1086_v12 = vsub.f32 %v3293_v47, %v3861_v24  ;;  %v3364_v45 = vsub.f32 %v87_v32, %v3325_v17  ;;  %2100 = vmatprep.subr.mxu0 %v3257_v34  ;;  %v3863_v51 = vand.u32 4294901760, %v3245_v39  ;;  %v1092_v61 = vsub.f32 %v3304_v49, %v3864_v63 }
  0xa5   :  { %2126 = vmatpush3.msra.mxu1 %v1153_v52  ;;  %v1286_v60 = vand.u32 4294901760, %v1285_v36  ;;  %2101 = vmatpush3.msra.mxu0 %v3224_v0  ;;  %v1174_v24 = vand.u32 4294901760, %v1173_v30  ;;  %v3865_v32 = vand.u32 4294901760, %v3314_v43  ;;  %v3716_v57 = vand.u32 4294901760, %v3357_v6 }
  0xa6   :  { %3862 = vst [vmem:[#allocation38_spill] sm:$0xff] %v3364_v45  ;;  %2127 = vmatprep.subr.mxu1 %v1272_v21  ;;  %v1180_v52 = vsub.f32 %v3245_v39, %v3863_v51  ;;  %2102 = vmatprep.subr.mxu0 %v3290_v5  ;;  %v1293_v21 = vand.u32 4294901760, %v1292_v13  ;;  %v3866_v51 = vand.u32 4294901760, %v3272_v56  ;;  %v1087_v30 = vand.u32 4294901760, %v1086_v12 }
  0xa7   :  { %2128 = vmatpush3.msra.mxu1 %v1160_v20  ;;  %v1299_v9 = vsub.f32 %v3314_v43, %v3865_v32  ;;  %2103 = vmatpush3.msra.mxu0 %v3274_v62  ;;  %v3867_v20 = vand.u32 4294901760, %v3331_v15  ;;  %v3717_v36 = vand.u32 4294901760, %v3364_v45  ;;  %v1093_v13 = vand.u32 4294901760, %v1092_v61 }
  0xa8   :  { %2129 = vmatprep.subr.mxu1 %v1279_v42  ;;  %v1187_v63 = vsub.f32 %v3272_v56, %v3866_v51  ;;  %2104 = vmatprep.subr.mxu0 %v3299_v19  ;;  %v1181_v42 = vand.u32 4294901760, %v1180_v52  ;;  %v3868_v5 = vand.u32 4294901760, %v3308_v7  ;;  %v3869_v12 = vand.u32 4294901760, %v3348_v59 }
  0xa9   :  { %2130 = vmatpush3.msra.mxu1 %v1167_v18  ;;  %v1306_v32 = vsub.f32 %v3331_v15, %v3867_v20  ;;  %2105 = vmatpush3.msra.mxu0 %v3310_v14  ;;  %v1300_v18 = vand.u32 4294901760, %v1299_v9  ;;  %v3870_v61 = vand.u32 4294901760, %v3341_v2  ;;  %v1320_v9 = vsub.f32 %v3364_v45, %v3717_v36  ;;  %v3888_v36 = vld [vmem:[#allocation21_spill] sm:$0xff] }
  0xaa   :  { %2131 = vmatprep.subr.mxu1 %v1286_v60  ;;  %v1194_v51 = vsub.f32 %v3308_v7, %v3868_v5  ;;  %v1313_v20 = vsub.f32 %v3348_v59, %v3869_v12  ;;  %2106 = vmatprep.subr.mxu0 %v3325_v17  ;;  %v1188_v60 = vand.u32 4294901760, %v1187_v63  ;;  %v3874_v12 = vld [vmem:[#allocation27_spill] sm:$0xff] }
  0xab   :  { %2132 = vmatpush3.msra.mxu1 %v1174_v24  ;;  %v1201_v52 = vsub.f32 %v3341_v2, %v3870_v61  ;;  %2107 = vmatpush3.msra.mxu0 %v3327_v8  ;;  %v1307_v5 = vand.u32 4294901760, %v1306_v32  ;;  %v1321_v32 = vand.u32 4294901760, %v1320_v9  ;;  %v3877_v61 = vld [vmem:[#allocation31_spill] sm:$0xff]  ;;  %v3880_v9 = vld [vmem:[#allocation17_spill] sm:$0xff] }
  0xac   :  { %2133 = vmatprep.subr.mxu1 %v1293_v21  ;;  %1088 = vmatprep.mubr.f32.mxu0 %v1087_v30  ;;  %v1195_v24 = vand.u32 4294901760, %v1194_v51  ;;  %v1208_v21 = vsub.f32 %v3357_v6, %v3716_v57  ;;  %v1314_v63 = vand.u32 4294901760, %v1313_v20  ;;  %v3872_v51 = vld [vmem:[#allocation13_spill] sm:$0xff]  ;;  %v3875_v20 = vld [vmem:[#allocation24_spill] sm:$0xff] }
  0xad   :  { %2134 = vmatpush3.msra.mxu1 %v1181_v42  ;;  %1094 = vmatmul.mubr.f32.vlgmr.msra.gmra.mxu0 %v1093_v13  ;;  %v1202_v30 = vand.u32 4294901760, %v1201_v52  ;;  %v3871_v13 = vld [vmem:[#allocation25_spill] sm:$0xff]  ;;  %v3878_v52 = vld [vmem:[#allocation14_spill] sm:$0xff]  ;;  %v3887_v57 = vld [vmem:[#allocation32_spill] sm:$0xff] }
  0xae   :  { %2135 = vmatprep.subr.mxu1 %v1300_v18  ;;  %2146 = vmatprep.subr.mxu0 %v2975_v33  ;;  %v1209_v42 = vand.u32 4294901760, %v1208_v21  ;;  %v3873_v18 = vld [vmem:[#allocation29_spill] sm:$0xff]  ;;  %v3882_v21 = vld [vmem:[#allocation19_spill] sm:$0xff] }
  0xaf   :  { %2136 = vmatpush3.msra.mxu1 %v1188_v60  ;;  %2147 = vmatpush3.msra.mxu0 %v2962_v23  ;;  %v3876_v60 = vld [vmem:[#allocation15_spill] sm:$0xff] }
  0xb0   :  { %2137 = vmatprep.subr.mxu1 %v1307_v5  ;;  %2148 = vmatprep.subr.mxu0 %v2992_v25  ;;  %v3879_v5 = vld [vmem:[#allocation16_spill] sm:$0xff] }
  0xb1   :  { %2138 = vmatpush3.msra.mxu1 %v1195_v24  ;;  %2149 = vmatpush3.msra.mxu0 %v2970_v40  ;;  %v3881_v24 = vld [vmem:[#allocation18_spill] sm:$0xff] }
  0xb2   :  { %2139 = vmatprep.subr.mxu1 %v1314_v63  ;;  %2150 = vmatprep.subr.mxu0 %v3002_v37  ;;  %v3883_v63 = vld [vmem:[#allocation28_spill] sm:$0xff] }
  0xb3   :  { %2140 = vmatpush3.msra.mxu1 %v1202_v30  ;;  %2151 = vmatpush3.msra.mxu0 %v3008_v27  ;;  %v3884_v30 = vld [vmem:[#allocation11_spill] sm:$0xff] }
  0xb4   :  { %2141 = vmatprep.subr.mxu1 %v1321_v32  ;;  %2152 = vmatprep.subr.mxu0 %v3048_v10  ;;  %v3885_v32 = vld [vmem:[#allocation30_spill] sm:$0xff] }
  0xb5   :  { %2142 = vmatpush3.msra.mxu1 %v1209_v42  ;;  %1324 = vmatprep.mubr.f32.mxu1 %v3252_v48  ;;  %v3886_v42 = vld [vmem:[#allocation20_spill] sm:$0xff] }
  0xb6   :  { %2153 = vmatpush3.msra.mxu0 %v3014_v41  ;;  %1326 = vmatmul.mubr.f32.vlgmr.msra.gmra.mxu1 %v3264_v3  ;;  %v3889_v3 = vld [vmem:[#allocation22_spill] sm:$0xff]  ;;  %v3890_v48 = vld [vmem:[#allocation12_spill] sm:$0xff] }
  0xb7   :  { %2154 = vmatprep.subr.mxu0 %v3066_v28  ;;  %2181 = vmatprep.subr.mxu1 %v2948_v16 }
  0xb8   :  { %2155 = vmatpush3.msra.mxu0 %v3060_v22  ;;  %2182 = vmatpush3.msra.mxu1 %v2943_v58 }
  0xb9   :  { %2156 = vmatprep.subr.mxu0 %v3081_v31  ;;  %2183 = vmatprep.subr.mxu1 %v2964_v11 }
  0xba   :  { %2157 = vmatpush3.msra.mxu0 %v3078_v38  ;;  %2184 = vmatpush3.msra.mxu1 %v3871_v13 }
  0xbb   :  { %2158 = vmatprep.subr.mxu0 %v3127_v50  ;;  %2185 = vmatprep.subr.mxu1 %v3872_v51 }
  0xbc   :  { %2159 = vmatpush3.msra.mxu0 %v3873_v18  ;;  %2186 = vmatpush3.msra.mxu1 %v3874_v12 }
  0xbd   :  { %2160 = vmatprep.subr.mxu0 %v3875_v20  ;;  %2187 = vmatprep.subr.mxu1 %v3876_v60 }
  0xbe   :  { %2161 = vmatpush3.msra.mxu0 %v3877_v61  ;;  %2188 = vmatpush3.msra.mxu1 %v3878_v52 }
  0xbf   :  { %2162 = vmatprep.subr.mxu0 %v3191_v53  ;;  %2189 = vmatprep.subr.mxu1 %v3879_v5 }
  0xc0   :  { %2163 = vmatpush3.msra.mxu0 %v3161_v4  ;;  %2190 = vmatpush3.msra.mxu1 %v3880_v9 }
  0xc1   :  { %2164 = vmatprep.subr.mxu0 %v3234_v46  ;;  %2191 = vmatprep.subr.mxu1 %v3881_v24 }
  0xc2   :  { %2165 = vmatpush3.msra.mxu0 %v3176_v1  ;;  %2192 = vmatpush3.msra.mxu1 %v3882_v21 }
  0xc3   :  { %2166 = vmatprep.subr.mxu0 %v3261_v55  ;;  %2193 = vmatprep.subr.mxu1 %v3883_v63 }
  0xc4   :  { %2167 = vmatpush3.msra.mxu0 %v3229_v26  ;;  %2194 = vmatpush3.msra.mxu1 %v3884_v30 }
  0xc5   :  { %2168 = vmatprep.subr.mxu0 %v3283_v35  ;;  %2195 = vmatprep.subr.mxu1 %v3885_v32 }
  0xc6   :  { %2169 = vmatpush3.msra.mxu0 %v3245_v39  ;;  %2196 = vmatpush3.msra.mxu1 %v3886_v42 }
  0xc7   :  { %2170 = vmatprep.subr.mxu0 %v3314_v43  ;;  %2197 = vmatprep.subr.mxu1 %v3887_v57 }
  0xc8   :  { %2171 = vmatpush3.msra.mxu0 %v3272_v56  ;;  %2198 = vmatpush3.msra.mxu1 %v3888_v36 }
  0xc9   :  { %2172 = vmatprep.subr.mxu0 %v3331_v15  ;;  %2199 = vmatprep.subr.mxu1 %v3147_v29  ;;  %v3891_v29 = vld [vmem:[#allocation33_spill] sm:$0xff] }
  0xca   :  { %2173 = vmatpush3.msra.mxu0 %v3308_v7  ;;  %2200 = vmatpush3.msra.mxu1 %v3889_v3 }
  0xcb   :  { %2174 = vmatprep.subr.mxu0 %v3348_v59  ;;  %2201 = vmatprep.subr.mxu1 %v3890_v48  ;;  %v3892_v48 = vand.u32 4294901760, %v2975_v33  ;;  %v3897_v33 = vand.u32 4294901760, %v3002_v37  ;;  %v3903_v37 = vand.u32 4294901760, %v3066_v28  ;;  %v3907_v28 = vand.u32 4294901760, %v3127_v50 }
  0xcc   :  { %2175 = vmatpush3.msra.mxu0 %v3341_v2  ;;  %2202 = vmatpush3.msra.mxu1 %v3188_v44  ;;  %v3893_v44 = vand.u32 4294901760, %v2962_v23  ;;  %v3898_v23 = vand.u32 4294901760, %v3008_v27  ;;  %v3904_v27 = vand.u32 4294901760, %v3060_v22  ;;  %v3911_v22 = vand.u32 4294901760, %v3191_v53 }
  0xcd   :  { %2176 = vmatprep.subr.mxu0 %v3364_v45  ;;  %2203 = vmatprep.subr.mxu1 %v3208_v54  ;;  %v3894_v45 = vld [vmem:[#allocation36_spill] sm:$0xff]  ;;  %v3912_v50 = vand.u32 4294901760, %v3161_v4  ;;  %v3915_v53 = vand.u32 4294901760, %v3261_v55  ;;  %v3916_v4 = vand.u32 4294901760, %v3229_v26  ;;  %v3920_v26 = vand.u32 4294901760, %v3272_v56  ;;  %v3927_v56 = vld [vmem:[#allocation26_spill] sm:$0xff] }
  0xce   :  { %2177 = vmatpush3.msra.mxu0 %v3357_v6  ;;  %1461 = vmatprep.mubr.f32.mxu0 %v3293_v47  ;;  %v3895_v6 = vand.u32 4294901760, %v2992_v25  ;;  %v3899_v25 = vand.u32 4294901760, %v3048_v10  ;;  %v3905_v10 = vand.u32 4294901760, %v3081_v31  ;;  %v3914_v31 = vand.u32 4294901760, %v3176_v1 }
  0xcf   :  { %2204 = vmatpush3.msra.mxu1 %v3891_v29  ;;  %1464 = vmatmul.mubr.f32.vlgmr.msra.gmra.mxu0 %v3304_v49  ;;  %v3896_v29 = vand.u32 4294901760, %v2970_v40  ;;  %v3900_v40 = vand.u32 4294901760, %v3293_v47  ;;  %v3918_v1 = vand.u32 4294901760, %v3245_v39  ;;  %v3921_v55 = vand.u32 4294901760, %v3331_v15  ;;  %v3925_v47 = vld [vmem:[#allocation12_spill] sm:$0xff] }
  0xd0   :  { %2205 = vmatprep.subr.mxu1 %v3257_v34  ;;  %2216 = vmatprep.subr.mxu0 %v3892_v48  ;;  %v3919_v48 = vand.u32 4294901760, %v3314_v43  ;;  %v3923_v39 = vand.u32 4294901760, %v3308_v7  ;;  %v3924_v43 = vand.u32 4294901760, %v3348_v59  ;;  %v3934_v59 = vld [vmem:[#allocation35_spill] sm:$0xff] }
  0xd1   :  { %2206 = vmatpush3.msra.mxu1 %v3224_v0  ;;  %2217 = vmatpush3.msra.mxu0 %v3893_v44  ;;  %v3902_v44 = vand.u32 4294901760, %v3304_v49  ;;  %v3928_v49 = vld [vmem:[#allocation38_spill] sm:$0xff] }
  0xd2   :  { %2207 = vmatprep.subr.mxu1 %v3894_v45  ;;  %2218 = vmatprep.subr.mxu0 %v3895_v6  ;;  %v3929_v15 = vand.u32 4294901760, %v3928_v49  ;;  %v3930_v6 = vld [vmem:[#allocation37_spill] sm:$0xff] }
  0xd3   :  { %2208 = vmatpush3.msra.mxu1 %v3274_v62  ;;  %2219 = vmatpush3.msra.mxu0 %v3896_v29  ;;  %v3901_v29 = vand.u32 4294901760, %v3014_v41  ;;  %v3906_v41 = vand.u32 4294901760, %v3078_v38  ;;  %v3913_v38 = vand.u32 4294901760, %v3234_v46  ;;  %v3917_v46 = vand.u32 4294901760, %v3283_v35  ;;  %v3922_v35 = vld [vmem:[#allocation23_spill] sm:$0xff] }
  0xd4   :  { %2209 = vmatprep.subr.mxu1 %v3299_v19  ;;  %2220 = vmatprep.subr.mxu0 %v3897_v33  ;;  %v3931_v7 = vand.u32 4294901760, %v3930_v6 }
  0xd5   :  { %2210 = vmatpush3.msra.mxu1 %v3310_v14  ;;  %2221 = vmatpush3.msra.mxu0 %v3898_v23 }
  0xd6   :  { %2211 = vmatprep.subr.mxu1 %v3325_v17  ;;  %2222 = vmatprep.subr.mxu0 %v3899_v25 }
  0xd7   :  { %2212 = vmatpush3.msra.mxu1 %v3327_v8  ;;  %1568 = vmatprep.mubr.f32.mxu1 %v3900_v40 }
  0xd8   :  { %2223 = vmatpush3.msra.mxu0 %v3901_v29  ;;  %1572 = vmatmul.mubr.f32.vlgmr.msra.gmra.mxu1 %v3902_v44 }
  0xd9   :  { %2224 = vmatprep.subr.mxu0 %v3903_v37  ;;  %2251 = vmatprep.subr.mxu1 %v2948_v16  ;;  %v3908_v16 = vand.u32 4294901760, %v3873_v18 }
  0xda   :  { %2225 = vmatpush3.msra.mxu0 %v3904_v27  ;;  %2252 = vmatpush3.msra.mxu1 %v2943_v58  ;;  %v3909_v58 = vand.u32 4294901760, %v3875_v20 }
  0xdb   :  { %2226 = vmatprep.subr.mxu0 %v3905_v10  ;;  %2253 = vmatprep.subr.mxu1 %v2964_v11  ;;  %v3910_v11 = vand.u32 4294901760, %v3877_v61 }
  0xdc   :  { %2227 = vmatpush3.msra.mxu0 %v3906_v41  ;;  %2254 = vmatpush3.msra.mxu1 %v3871_v13 }
  0xdd   :  { %2228 = vmatprep.subr.mxu0 %v3907_v28  ;;  %2255 = vmatprep.subr.mxu1 %v3872_v51 }
  0xde   :  { %2229 = vmatpush3.msra.mxu0 %v3908_v16  ;;  %2256 = vmatpush3.msra.mxu1 %v3874_v12 }
  0xdf   :  { %2230 = vmatprep.subr.mxu0 %v3909_v58  ;;  %2257 = vmatprep.subr.mxu1 %v3876_v60 }
  0xe0   :  { %2231 = vmatpush3.msra.mxu0 %v3910_v11  ;;  %2258 = vmatpush3.msra.mxu1 %v3878_v52 }
  0xe1   :  { %2232 = vmatprep.subr.mxu0 %v3911_v22  ;;  %2259 = vmatprep.subr.mxu1 %v3879_v5 }
  0xe2   :  { %2233 = vmatpush3.msra.mxu0 %v3912_v50  ;;  %2260 = vmatpush3.msra.mxu1 %v3880_v9 }
  0xe3   :  { %2234 = vmatprep.subr.mxu0 %v3913_v38  ;;  %2261 = vmatprep.subr.mxu1 %v3881_v24 }
  0xe4   :  { %2235 = vmatpush3.msra.mxu0 %v3914_v31  ;;  %2262 = vmatpush3.msra.mxu1 %v3882_v21 }
  0xe5   :  { %2236 = vmatprep.subr.mxu0 %v3915_v53  ;;  %2263 = vmatprep.subr.mxu1 %v3883_v63 }
  0xe6   :  { %2237 = vmatpush3.msra.mxu0 %v3916_v4  ;;  %2264 = vmatpush3.msra.mxu1 %v3884_v30 }
  0xe7   :  { %2238 = vmatprep.subr.mxu0 %v3917_v46  ;;  %2265 = vmatprep.subr.mxu1 %v3885_v32 }
  0xe8   :  { %2239 = vmatpush3.msra.mxu0 %v3918_v1  ;;  %2266 = vmatpush3.msra.mxu1 %v3886_v42 }
  0xe9   :  { %2240 = vmatprep.subr.mxu0 %v3919_v48  ;;  %2267 = vmatprep.subr.mxu1 %v3887_v57  ;;  %v3926_v57 = vand.u32 4294901760, %v3341_v2 }
  0xea   :  { %2241 = vmatpush3.msra.mxu0 %v3920_v26  ;;  %2268 = vmatpush3.msra.mxu1 %v3888_v36  ;;  %v3932_v36 = vld [vmem:[#allocation34_spill] sm:$0xff] }
  0xeb   :  { %2242 = vmatprep.subr.mxu0 %v3921_v55  ;;  %2269 = vmatprep.subr.mxu1 %v3922_v35 }
  0xec   :  { %2243 = vmatpush3.msra.mxu0 %v3923_v39  ;;  %2270 = vmatpush3.msra.mxu1 %v3889_v3  ;;  %v3933_v3 = vld [vmem:[#allocation33_spill] sm:$0xff] }
  0xed   :  { %2244 = vmatprep.subr.mxu0 %v3924_v43  ;;  %2271 = vmatprep.subr.mxu1 %v3925_v47 }
  0xee   :  { %2245 = vmatpush3.msra.mxu0 %v3926_v57  ;;  %2272 = vmatpush3.msra.mxu1 %v3927_v56 }
  0xef   :  { %2246 = vmatprep.subr.mxu0 %v3929_v15  ;;  %2273 = vmatprep.subr.mxu1 %v3208_v54 }
  0xf0   :  { %2247 = vmatpush3.msra.mxu0 %v3931_v7  ;;  %1738 = vmatprep.mubr.f32.mxu0 %v3932_v36 }
  0xf1   :  { %2274 = vmatpush3.msra.mxu1 %v3933_v3  ;;  %1740 = vmatmul.mubr.f32.vlgmr.msra.gmra.mxu0 %v3934_v59 }
  0xf2   :  { %2275 = vmatprep.subr.mxu1 %v3257_v34  ;;  %1842 = vmatprep.mubr.f32.mxu1 %v3932_v36 }
  0xf3   :  { %2276 = vmatpush3.msra.mxu1 %v3224_v0 }
  0xf4   :  { %2277 = vmatprep.subr.mxu1 %v3894_v45 }
  0xf5   :  { %2278 = vmatpush3.msra.mxu1 %v3274_v62 }
  0xf6   :  { %2279 = vmatprep.subr.mxu1 %v3299_v19 }
  0xf7   :  { %2280 = vmatpush3.msra.mxu1 %v3310_v14 }
  0xf8   :  { %2281 = vmatprep.subr.mxu1 %v3325_v17 }
  0xf9   :  { %2282 = vmatpush3.msra.mxu1 %v3327_v8 }
  0xfa   :  { %1844 = vmatmul.mubr.f32.vlgmr.msra.gmra.mxu1 %v3934_v59 }
 0x10b   :  { %v1898_v54 = vpop.f32.mrf.mxu0 }
 0x10d   :  { %v1899_v34 = vpop.f32.mrf.mxu0  ;;  %v1933_v2 = vpop.f32.mrf.mxu1 }
 0x10e   :  { %v1900_v61 = vadd.f32 %v1899_v34, %v1898_v54 }
 0x10f   :  { %v1934_v51 = vpop.f32.mrf.mxu1 }
 0x110   :  { %v1935_v60 = vadd.f32 %v1934_v51, %v1933_v2 }
 0x112   :  { %v466_v5 = vadd.f32 %v1935_v60, %v1900_v61 }
 0x12b   :  { %v1968_v13 = vpop.f32.mrf.mxu0 }
 0x12d   :  { %v1969_v0 = vpop.f32.mrf.mxu0 }
 0x12e   :  { %v1970_v17 = vadd.f32 %v1969_v0, %v1968_v13 }
 0x130   :  { %v604_v21 = vadd.f32 %v1970_v17, %v466_v5 }
 0x131   :  { %v2003_v18 = vpop.f32.mrf.mxu1 }
 0x133   :  { %v2004_v12 = vpop.f32.mrf.mxu1 }
 0x134   :  { %v2005_v9 = vadd.f32 %v2004_v12, %v2003_v18 }
 0x136   :  { %v712_v32 = vadd.f32 %v2005_v9, %v604_v21 }
 0x14b   :  { %v2038_v45 = vpop.f32.mrf.mxu0 }
 0x14d   :  { %v2039_v62 = vpop.f32.mrf.mxu0 }
 0x14e   :  { %v2040_v63 = vadd.f32 %v2039_v62, %v2038_v45 }
 0x150   :  { %v880_v25 = vadd.f32 %v2040_v63, %v712_v32 }
 0x154   :  { %v2073_v20 = vpop.f32.mrf.mxu1 }
 0x156   :  { %v2074_v14 = vpop.f32.mrf.mxu1 }
 0x157   :  { %v2075_v42 = vadd.f32 %v2074_v14, %v2073_v20 }
 0x159   :  { %v984_v44 = vadd.f32 %v2075_v42, %v880_v25 }
 0x16d   :  { %v2108_v19 = vpop.f32.mrf.mxu0 }
 0x16f   :  { %v2109_v52 = vpop.f32.mrf.mxu0 }
 0x170   :  { %v2110_v40 = vadd.f32 %v2109_v52, %v2108_v19 }
 0x172   :  { %v1096_v10 = vadd.f32 %v2110_v40, %v984_v44 }
 0x176   :  { %v2143_v8 = vpop.f32.mrf.mxu1 }
 0x178   :  { %v2144_v30 = vpop.f32.mrf.mxu1 }
 0x179   :  { %v2145_v37 = vadd.f32 %v2144_v30, %v2143_v8 }
 0x17b   :  { %v1328_v16 = vadd.f32 %v2145_v37, %v1096_v10 }
 0x18f   :  { %v2178_v24 = vpop.f32.mrf.mxu0 }
 0x191   :  { %v2179_v33 = vpop.f32.mrf.mxu0 }
 0x192   :  { %v2180_v41 = vadd.f32 %v2179_v33, %v2178_v24 }
 0x194   :  { %v1466_v11 = vadd.f32 %v2180_v41, %v1328_v16 }
 0x198   :  { %v2213_v23 = vpop.f32.mrf.mxu1 }
 0x19a   :  { %v2214_v27 = vpop.f32.mrf.mxu1 }
 0x19b   :  { %v2215_v58 = vadd.f32 %v2214_v27, %v2213_v23 }
 0x19d   :  { %v1574_v38 = vadd.f32 %v2215_v58, %v1466_v11 }
 0x1b1   :  { %v2248_v29 = vpop.f32.mrf.mxu0 }
 0x1b3   :  { %v2249_v28 = vpop.f32.mrf.mxu0 }
 0x1b4   :  { %v2250_v22 = vadd.f32 %v2249_v28, %v2248_v29 }
 0x1b6   :  { %v1742_v53 = vadd.f32 %v2250_v22, %v1574_v38 }
 0x1ba   :  { %v2283_v50 = vpop.f32.mrf.mxu1 }
 0x1bc   :  { %v2284_v31 = vpop.f32.mrf.mxu1 }
 0x1bd   :  { %v2285_v4 = vadd.f32 %v2284_v31, %v2283_v50 }
 0x1bf   :  { %v1846_v46 = vadd.f32 %v2285_v4, %v1742_v53 }
 0x1c1   :  { %1849 = vst [vmem:[#allocation7] sm:$0x3] %v1846_v46 }
 0x1c2   :  { %2344 = shalt.err (!%p2341_p0)
}
 0x1c3   :  { %1859 = dma.vmem_to_hbm [thread:$0]  %s1857_s1, 32, %s3586_s2, [#allocation4]  }
 0x1c4   :  { %2357 = dma.done.wait [#allocation4], 32  }
 0x1c5   :  { %2358 = vsyncadd [#allocation4], 4294967264 }
 0x1c6   :  { %1863 = vsyncpa [#allocation3], 1 }
 0x1c7   :  { %1864 = vsyncpa [#allocation6], 1 }
 0x1c8   :  { %1865 = vsyncpa [#allocation4], 1 }

</bundles_post_ra>
